<compile_context>
chip_gen: v7x
topology: tpu7x:2x2x1
jax: 0.10.0
libtpu: 0.0.40
codegen_flags: <defaults>
</compile_context>

<pallas_src>
import functools
import math

import jax
import jax.numpy as jnp
from jax.experimental import pallas as pl
from jax.experimental.pallas import tpu as pltpu

PARAM_DTYPE = jnp.bfloat16

# Tile targets.  512-class tiles keep the big matmuls off the HBM roofline while
# fitting every generation's scoped VMEM (double-buffered blocks + f32
# accumulator ~4-7 MiB per kernel).  On v6e (128 MiB VMEM) TM/TN can be raised
# further together with VMEM_LIMIT_BYTES; on v7x keep <= 512 and make sure the
# parallel grid axes keep >= 2 blocks so both TensorCores get work.
TM, TN, TK = 512, 512, 512
# Safe on v5e/v6e (128 MiB physical) and v7x (64 MiB physical), above the
# 16/32 MiB scoped defaults so the larger tiles always fit.
VMEM_LIMIT_BYTES = 48 * 1024 * 1024


def _round_up(x, m):
    return ((x + m - 1) // m) * m


def _pick_tile(dim, target, unit):
    """Largest tile <= target that evenly divides `dim` and is `unit`-aligned;
    falls back to the full dim (full-dim blocks are always legal)."""
    if dim <= target:
        return dim
    t = target
    while t >= unit and dim % t:
        t //= 2
    return t if (t >= unit and dim % t == 0) else dim


def _pad_rows(x, m_pad):
    m = x.shape[0]
    return x if m == m_pad else jnp.pad(x, ((0, m_pad - m), (0, 0)))


# --------------------------- tiled linear ------------------------------------

def _matmul_kernel(x_ref, w_ref, b_ref, o_ref, acc_ref, *, act):
    """y = act(x @ w + b), K-accumulated; x:[tm,tk] bf16, w:[tk,tn] bf16."""
    @pl.when(pl.program_id(2) == 0)
    def _():
        acc_ref[...] = jnp.zeros_like(acc_ref)

    acc_ref[...] += jnp.dot(x_ref[...], w_ref[...],
                            preferred_element_type=jnp.float32)

    @pl.when(pl.program_id(2) == pl.num_programs(2) - 1)
    def _():
        y = acc_ref[...] + b_ref[...].astype(jnp.float32)
        if act == "gelu":
            # TODO(synk): HF BERT uses erf-GELU; tanh approximation used here.
            y = jax.nn.gelu(y, approximate=True)
        elif act == "tanh":
            y = jnp.tanh(y)
        o_ref[...] = y.astype(o_ref.dtype)


def linear(x, w, b, act="none"):
    M, K = x.shape
    N = w.shape[1]
    tm = min(TM, _round_up(M, 8))
    m_pad = _round_up(M, tm)          # pad rows instead of a single-block fallback
    tn = _pick_tile(N, TN, 128)
    tk = _pick_tile(K, TK, 128)
    xp = _pad_rows(x, m_pad)
    out = pl.pallas_call(
        functools.partial(_matmul_kernel, act=act),
        out_shape=jax.ShapeDtypeStruct((m_pad, N), x.dtype),
        grid=(m_pad // tm, N // tn, K // tk),
        in_specs=[
            pl.BlockSpec((tm, tk), lambda i, j, k: (i, k)),
            pl.BlockSpec((tk, tn), lambda i, j, k: (k, j)),
            pl.BlockSpec((1, tn), lambda i, j, k: (0, j)),
        ],
        out_specs=pl.BlockSpec((tm, tn), lambda i, j, k: (i, j)),
        scratch_shapes=[pltpu.VMEM((tm, tn), jnp.float32)],
        compiler_params=pltpu.CompilerParams(
            dimension_semantics=("parallel", "parallel", "arbitrary"),
            vmem_limit_bytes=VMEM_LIMIT_BYTES),
    )(xp, w, b.reshape(1, N))
    return out if m_pad == M else out[:M]


# ----------------- tiled linear with fused Add + LayerNorm epilogue ----------

def _matmul_add_ln_kernel(x_ref, w_ref, b_ref, r_ref, g_ref, bb_ref, o_ref,
                          acc_ref, *, eps):
    """LayerNorm(x @ w + b + residual); LN runs over the full (un-tiled) N axis."""
    @pl.when(pl.program_id(1) == 0)
    def _():
        acc_ref[...] = jnp.zeros_like(acc_ref)

    acc_ref[...] += jnp.dot(x_ref[...], w_ref[...],
                            preferred_element_type=jnp.float32)

    @pl.when(pl.program_id(1) == pl.num_programs(1) - 1)
    def _():
        y = (acc_ref[...] + b_ref[...].astype(jnp.float32)
             + r_ref[...].astype(jnp.float32))
        mu = jnp.mean(y, axis=-1, keepdims=True)
        var = jnp.mean(jnp.square(y - mu), axis=-1, keepdims=True)
        y = (y - mu) * jax.lax.rsqrt(var + eps)
        o_ref[...] = (y * g_ref[...].astype(jnp.float32)
                      + bb_ref[...].astype(jnp.float32)).astype(o_ref.dtype)


def linear_add_layernorm(x, w, b, residual, gamma, beta, eps=1e-12):
    # TODO(synk): on v7x, the (tm, N) residual block is pinned in VMEM for the
    # whole K loop but only read in the last-k epilogue; if tm is raised, move
    # it to memory_space=pl.ANY and DMA it under the final pl.when instead.
    M, K = x.shape
    N = w.shape[1]                       # N == hidden size; kept whole for the LN
    tm = min(TM, _round_up(M, 8))
    m_pad = _round_up(M, tm)
    tk = _pick_tile(K, TK, 128)
    xp = _pad_rows(x, m_pad)
    rp = _pad_rows(residual, m_pad)
    out = pl.pallas_call(
        functools.partial(_matmul_add_ln_kernel, eps=eps),
        out_shape=jax.ShapeDtypeStruct((m_pad, N), x.dtype),
        grid=(m_pad // tm, K // tk),
        in_specs=[
            pl.BlockSpec((tm, tk), lambda i, k: (i, k)),
            pl.BlockSpec((tk, N), lambda i, k: (k, 0)),
            pl.BlockSpec((1, N), lambda i, k: (0, 0)),
            pl.BlockSpec((tm, N), lambda i, k: (i, 0)),
            pl.BlockSpec((1, N), lambda i, k: (0, 0)),
            pl.BlockSpec((1, N), lambda i, k: (0, 0)),
        ],
        out_specs=pl.BlockSpec((tm, N), lambda i, k: (i, 0)),
        scratch_shapes=[pltpu.VMEM((tm, N), jnp.float32)],
        compiler_params=pltpu.CompilerParams(
            dimension_semantics=("parallel", "arbitrary"),
            vmem_limit_bytes=VMEM_LIMIT_BYTES),
    )(xp, w, b.reshape(1, N), rp, gamma.reshape(1, N), beta.reshape(1, N))
    return out if m_pad == M else out[:M]


# ------------------ fused embedding-sum + LayerNorm ---------------------------

def _embed_ln_kernel(tok_ref, pos_ref, typ_ref, g_ref, b_ref, o_ref, *, eps):
    x = (tok_ref[...].astype(jnp.float32)
         + pos_ref[...].astype(jnp.float32)
         + typ_ref[...].astype(jnp.float32))
    mu = jnp.mean(x, axis=-1, keepdims=True)
    var = jnp.mean(jnp.square(x - mu), axis=-1, keepdims=True)
    y = (x - mu) * jax.lax.rsqrt(var + eps)
    o_ref[...] = (y * g_ref[...].astype(jnp.float32)
                  + b_ref[...].astype(jnp.float32)).astype(o_ref.dtype)


def embed_layernorm(tok, pos, typ, gamma, beta, eps=1e-12):
    """LayerNorm(tok + pos + typ): the sum is fused into the LN kernel (no
    intermediate B*S*H embedding slab round-tripped through HBM)."""
    B, S, H = tok.shape
    ts = _pick_tile(S, TM, 8)
    return pl.pallas_call(
        functools.partial(_embed_ln_kernel, eps=eps),
        out_shape=jax.ShapeDtypeStruct((B, S, H), tok.dtype),
        grid=(B, S // ts),
        in_specs=[
            pl.BlockSpec((None, ts, H), lambda b, s: (b, s, 0)),
            pl.BlockSpec((ts, H), lambda b, s: (s, 0)),
            pl.BlockSpec((1, H), lambda b, s: (0, 0)),
            pl.BlockSpec((1, H), lambda b, s: (0, 0)),
            pl.BlockSpec((1, H), lambda b, s: (0, 0)),
        ],
        out_specs=pl.BlockSpec((None, ts, H), lambda b, s: (b, s, 0)),
        compiler_params=pltpu.CompilerParams(
            dimension_semantics=("parallel", "parallel")),
    )(tok, pos, typ, gamma.reshape(1, H), beta.reshape(1, H))


# --------------------------- attention ----------------------------------------

def _attn_kernel_grouped(q_ref, k_ref, v_ref, m_ref, o_ref, *, scale, dh, hpb):
    """Lane-aligned head groups: q/k/v refs are [S, hpb*dh] column groups taken
    straight out of the fused qkv buffer; mask is a [1, S] additive bias."""
    mask = m_ref[...]                                     # f32
    for h in range(hpb):                                  # static unroll over heads
        sl = slice(h * dh, (h + 1) * dh)
        q = q_ref[:, sl] * scale                          # fold 1/sqrt(dh) into q
        k = k_ref[:, sl]
        v = v_ref[:, sl]
        s = jax.lax.dot_general(q, k, (((1,), (1,)), ((), ())),
                                preferred_element_type=jnp.float32)
        s = s + mask                                      # [S,S] + [1,S]
        mx = jnp.max(s, axis=-1, keepdims=True)
        p = jnp.exp(s - mx)
        inv = pl.reciprocal(jnp.sum(p, axis=-1, keepdims=True), approx=True)
        o = jnp.dot(p.astype(v.dtype), v, preferred_element_type=jnp.float32)
        o_ref[:, sl] = (o * inv).astype(o_ref.dtype)      # direct per-head store


def _attn_kernel_allheads(qkv_ref, m_ref, o_ref, *, scale, dh, nh, H):
    """Small-H fallback: full [S, 3H] qkv block per batch element, all heads in
    one grid step.  The whole output block (< one vreg lane width in practice)
    is built in registers and stored once."""
    mask = m_ref[...]
    outs = []
    for h in range(nh):
        q = qkv_ref[:, h * dh:(h + 1) * dh] * scale
        k = qkv_ref[:, H + h * dh:H + (h + 1) * dh]
        v = qkv_ref[:, 2 * H + h * dh:2 * H + (h + 1) * dh]
        s = jax.lax.dot_general(q, k, (((1,), (1,)), ((), ())),
                                preferred_element_type=jnp.float32) + mask
        mx = jnp.max(s, axis=-1, keepdims=True)
        p = jnp.exp(s - mx)
        inv = pl.reciprocal(jnp.sum(p, axis=-1, keepdims=True), approx=True)
        o = jnp.dot(p.astype(v.dtype), v, preferred_element_type=jnp.float32)
        outs.append(o * inv)
    o_ref[...] = jnp.concatenate(outs, axis=-1).astype(o_ref.dtype)


def attention(qkv, mask_bias, *, nh, hidden):
    """qkv: [B, S, 3H] fused projection (q|k|v along the last axis, heads packed
    inside each H span); mask_bias: [B, 1, S] f32 additive bias."""
    B, S, _ = qkv.shape
    H = hidden
    dh = H // nh
    scale = 1.0 / math.sqrt(dh)
    out_shape = jax.ShapeDtypeStruct((B, S, H), qkv.dtype)
    # TODO(synk): for long sequences (S >= ~1024) switch to a KV-blocked
    # online-softmax (flash) form instead of materializing the [S,S] score tile.
    hpb = min(nh, max(1, 128 // dh))       # pack heads -> lane-dense blocks
    while nh % hpb:
        hpb -= 1
    hw = hpb * dh
    if hw % 128 == 0:
        # Index q/k/v column groups straight out of the fused qkv buffer via
        # BlockSpecs -- no q/k/v copies materialized in HBM.
        nblk = H // hw
        q_spec = pl.BlockSpec((None, S, hw), lambda b, g: (b, 0, g))
        k_spec = pl.BlockSpec((None, S, hw), lambda b, g: (b, 0, nblk + g))
        v_spec = pl.BlockSpec((None, S, hw), lambda b, g: (b, 0, 2 * nblk + g))
        return pl.pallas_call(
            functools.partial(_attn_kernel_grouped, scale=scale, dh=dh, hpb=hpb),
            out_shape=out_shape,
            grid=(B, nh // hpb),
            in_specs=[q_spec, k_spec, v_spec,
                      pl.BlockSpec((None, 1, S), lambda b, g: (b, 0, 0))],
            out_specs=pl.BlockSpec((None, S, hw), lambda b, g: (b, 0, g)),
            compiler_params=pltpu.CompilerParams(
                dimension_semantics=("parallel", "parallel")),
        )(qkv, qkv, qkv, mask_bias)
    # Head-group width not lane-aligned (toy / small-H configs): take the full
    # 3H-wide block (block == full last dim is always a legal layout).
    return pl.pallas_call(
        functools.partial(_attn_kernel_allheads, scale=scale, dh=dh, nh=nh, H=H),
        out_shape=out_shape,
        grid=(B,),
        in_specs=[pl.BlockSpec((None, S, 3 * H), lambda b: (b, 0, 0)),
                  pl.BlockSpec((None, 1, S), lambda b: (b, 0, 0))],
        out_specs=pl.BlockSpec((None, S, H), lambda b: (b, 0, 0)),
        compiler_params=pltpu.CompilerParams(dimension_semantics=("parallel",)),
    )(qkv, mask_bias)


# --------------------------- pooler + classifier head -------------------------

def _pool_fc_kernel(cls_ref, pw_ref, pb_ref, fw_ref, fb_ref, o_ref):
    pooled = jnp.tanh(
        jnp.dot(cls_ref[...], pw_ref[...], preferred_element_type=jnp.float32)
        + pb_ref[...].astype(jnp.float32))
    logits = (jnp.dot(pooled.astype(fw_ref.dtype), fw_ref[...],
                      preferred_element_type=jnp.float32)
              + fb_ref[...].astype(jnp.float32))
    o_ref[...] = logits


def pooler_fc(cls_tok, pool_w, pool_b, fc_w_pad, fc_b_pad):
    """tanh(cls @ Wp + bp) @ Wfc + bfc; Wfc/bfc already lane-padded at init."""
    B, H = cls_tok.shape
    npad = fc_w_pad.shape[1]
    return pl.pallas_call(
        _pool_fc_kernel,
        out_shape=jax.ShapeDtypeStruct((B, npad), jnp.float32),
    )(cls_tok, pool_w, pool_b.reshape(1, H), fc_w_pad, fc_b_pad.reshape(1, npad))


# --------------------------- parameters ---------------------------------------

def init_params(key, *, vocab, max_pos, type_vocab, H, inter, n_layers, num_classes):
    keys = iter(jax.random.split(key, 8 + 6 * n_layers))

    def w(shape):
        return (0.02 * jax.random.normal(next(keys), shape, jnp.float32)
                ).astype(PARAM_DTYPE)

    def zeros(shape):
        return jnp.zeros(shape, PARAM_DTYPE)

    def ones(shape):
        return jnp.ones(shape, PARAM_DTYPE)

    # Classifier weights lane-padded to a 128 multiple once at init time.
    npad = max(128, _round_up(num_classes, 128))
    fc_w = jnp.pad(w((H, num_classes)), ((0, 0), (0, npad - num_classes)))
    fc_b = jnp.pad(zeros((num_classes,)), (0, npad - num_classes))

    params = {
        "tok_emb": w((vocab, H)),
        "pos_emb": w((max_pos, H)),
        "typ_emb": w((type_vocab, H)),
        "emb_ln_g": ones((H,)), "emb_ln_b": zeros((H,)),
        "layers": [],
        "pool_w": w((H, H)), "pool_b": zeros((H,)),
        "fc_w": fc_w, "fc_b": fc_b,
    }
    for _ in range(n_layers):
        params["layers"].append({
            # Q/K/V fused into one [H, 3H] projection (identical math to three
            # separate [H, H] projections concatenated on the output dim).
            "wqkv": w((H, 3 * H)), "bqkv": zeros((3 * H,)),
            "wo": w((H, H)), "bo": zeros((H,)),
            "ln1_g": ones((H,)), "ln1_b": zeros((H,)),
            "w1": w((H, inter)), "b1": zeros((inter,)),
            "w2": w((inter, H)), "b2": zeros((H,)),
            "ln2_g": ones((H,)), "ln2_b": zeros((H,)),
        })
    return params


# --------------------------- forward pass --------------------------------------

def bert_classifier_forward(params, input_ids, attention_mask, *, nh, num_classes):
    B, S = input_ids.shape
    H = params["tok_emb"].shape[1]

    # Embeddings (gather is XLA glue; token_type_ids default to all zeros).
    tok = jnp.take(params["tok_emb"], input_ids, axis=0)            # [B,S,H]
    pos = params["pos_emb"][:S]                                     # [S,H]
    typ = params["typ_emb"][0:1]                                    # [1,H]
    x = embed_layernorm(tok, pos, typ,
                        params["emb_ln_g"], params["emb_ln_b"]).reshape(B * S, H)

    # HF-style additive mask; kept in f32 even though activations are bf16.
    mask_bias = ((1.0 - attention_mask.astype(jnp.float32)) * -1e9).reshape(B, 1, S)

    for lyr in params["layers"]:
        # Fused QKV matmul; the [B,S,3H] result feeds attention directly
        # (reshape is free) -- q/k/v column groups are selected via BlockSpecs.
        qkv = linear(x, lyr["wqkv"], lyr["bqkv"]).reshape(B, S, 3 * H)
        ctx = attention(qkv, mask_bias, nh=nh, hidden=H).reshape(B * S, H)
        x = linear_add_layernorm(ctx, lyr["wo"], lyr["bo"], x,
                                 lyr["ln1_g"], lyr["ln1_b"])
        h = linear(x, lyr["w1"], lyr["b1"], act="gelu")
        x = linear_add_layernorm(h, lyr["w2"], lyr["b2"], x,
                                 lyr["ln2_g"], lyr["ln2_b"])

    # Pooler: tanh(W_p @ hidden[:,0] + b_p); Dropout(0.1) is identity at inference.
    cls_tok = x.reshape(B, S, H)[:, 0, :]                           # [B,H]
    logits = pooler_fc(cls_tok, params["pool_w"], params["pool_b"],
                       params["fc_w"], params["fc_b"])
    return logits[:, :num_classes]


# --------------------------- main ----------------------------------------------

if __name__ == "__main__":
    B, S, H, nh, inter, n_layers = 2, 8, 32, 2, 64, 2
    vocab, max_pos, type_vocab, num_classes = 100, 16, 2, 2

    key = jax.random.PRNGKey(0)
    pkey, ikey = jax.random.split(key)
    params = init_params(pkey, vocab=vocab, max_pos=max_pos, type_vocab=type_vocab,
                         H=H, inter=inter, n_layers=n_layers,
                         num_classes=num_classes)

    input_ids = jax.random.randint(ikey, (B, S), 0, vocab, dtype=jnp.int32)
    attention_mask = jnp.array([[1, 1, 1, 1, 1, 1, 1, 1],
                                [1, 1, 1, 1, 1, 0, 0, 0]], dtype=jnp.int32)

    fwd = jax.jit(functools.partial(bert_classifier_forward, nh=nh,
                                    num_classes=num_classes))
    logits = fwd(params, input_ids, attention_mask)
    jax.block_until_ready(logits)
    assert logits.shape == (B, num_classes)
    print("KERNEL_OK")
</pallas_src>

<mosaic_0001>
module attributes {stable_mosaic.version = 11 : i64} {
  func.func @_embed_ln_kernel(%arg0: i32, %arg1: i32, %arg2: memref<1x8x32xbf16, #tpu.memory_space<vmem>>, %arg3: memref<8x32xbf16, #tpu.memory_space<vmem>>, %arg4: memref<1x32xbf16, #tpu.memory_space<vmem>>, %arg5: memref<1x32xbf16, #tpu.memory_space<vmem>>, %arg6: memref<1x32xbf16, #tpu.memory_space<vmem>>, %arg7: memref<1x8x32xbf16, #tpu.memory_space<vmem>>) attributes {dimension_semantics = [#tpu.dimension_semantics<parallel>, #tpu.dimension_semantics<parallel>], iteration_bounds = array<i64: 2, 1>, scalar_prefetch = 0 : i64, scratch_operands = 0 : i64, tpu.core_type = #tpu.core_type<tc>, window_params = [{transform_indices = @transform_0, window_bounds = array<i64: 1, 8, 32>}, {transform_indices = @transform_1, window_bounds = array<i64: 8, 32>}, {pipeline_mode = #tpu.pipeline_mode<synchronous>, transform_indices = @transform_2, window_bounds = array<i64: 1, 32>}, {pipeline_mode = #tpu.pipeline_mode<synchronous>, transform_indices = @transform_3, window_bounds = array<i64: 1, 32>}, {pipeline_mode = #tpu.pipeline_mode<synchronous>, transform_indices = @transform_4, window_bounds = array<i64: 1, 32>}, {transform_indices = @transform_5, window_bounds = array<i64: 1, 8, 32>}]} {
    %c0 = arith.constant 0 : index
    %c0_0 = arith.constant 0 : index
    %c0_1 = arith.constant 0 : index
    %0 = vector.load %arg2[%c0, %c0_0, %c0_1] : memref<1x8x32xbf16, #tpu.memory_space<vmem>>, vector<1x8x32xbf16>
    %1 = vector.shape_cast %0 : vector<1x8x32xbf16> to vector<8x32xbf16>
    %2 = arith.extf %1 : vector<8x32xbf16> to vector<8x32xf32>
    %c0_2 = arith.constant 0 : index
    %c0_3 = arith.constant 0 : index
    %3 = vector.load %arg3[%c0_2, %c0_3] : memref<8x32xbf16, #tpu.memory_space<vmem>>, vector<8x32xbf16>
    %4 = arith.extf %3 : vector<8x32xbf16> to vector<8x32xf32>
    %5 = arith.addf %2, %4 : vector<8x32xf32>
    %c0_4 = arith.constant 0 : index
    %c0_5 = arith.constant 0 : index
    %6 = vector.load %arg4[%c0_4, %c0_5] : memref<1x32xbf16, #tpu.memory_space<vmem>>, vector<1x32xbf16>
    %7 = arith.extf %6 : vector<1x32xbf16> to vector<1x32xf32>
    %8 = vector.broadcast %7 : vector<1x32xf32> to vector<8x32xf32>
    %9 = arith.addf %5, %8 : vector<8x32xf32>
    %cst = arith.constant dense<0.000000e+00> : vector<8xf32>
    %10 = vector.multi_reduction <add>, %9, %cst [1] : vector<8x32xf32> to vector<8xf32>
    %11 = vector.shape_cast %10 : vector<8xf32> to vector<8x1xf32>
    %cst_6 = arith.constant 3.200000e+01 : f32
    %12 = vector.broadcast %cst_6 : f32 to vector<8x1xf32>
    %13 = arith.divf %11, %12 : vector<8x1xf32>
    %14 = vector.broadcast %13 : vector<8x1xf32> to vector<8x32xf32>
    %15 = arith.subf %9, %14 : vector<8x32xf32>
    %16 = arith.mulf %15, %15 : vector<8x32xf32>
    %cst_7 = arith.constant dense<0.000000e+00> : vector<8xf32>
    %17 = vector.multi_reduction <add>, %16, %cst_7 [1] : vector<8x32xf32> to vector<8xf32>
    %18 = vector.shape_cast %17 : vector<8xf32> to vector<8x1xf32>
    %cst_8 = arith.constant 3.200000e+01 : f32
    %19 = vector.broadcast %cst_8 : f32 to vector<8x1xf32>
    %20 = arith.divf %18, %19 : vector<8x1xf32>
    %21 = vector.broadcast %13 : vector<8x1xf32> to vector<8x32xf32>
    %22 = arith.subf %9, %21 : vector<8x32xf32>
    %cst_9 = arith.constant 9.99999996E-13 : f32
    %23 = vector.broadcast %cst_9 : f32 to vector<8x1xf32>
    %24 = arith.addf %20, %23 : vector<8x1xf32>
    %25 = math.rsqrt %24 : vector<8x1xf32>
    %26 = vector.broadcast %25 : vector<8x1xf32> to vector<8x32xf32>
    %27 = arith.mulf %22, %26 : vector<8x32xf32>
    %c0_10 = arith.constant 0 : index
    %c0_11 = arith.constant 0 : index
    %28 = vector.load %arg5[%c0_10, %c0_11] : memref<1x32xbf16, #tpu.memory_space<vmem>>, vector<1x32xbf16>
    %29 = arith.extf %28 : vector<1x32xbf16> to vector<1x32xf32>
    %30 = vector.broadcast %29 : vector<1x32xf32> to vector<8x32xf32>
    %31 = arith.mulf %27, %30 : vector<8x32xf32>
    %c0_12 = arith.constant 0 : index
    %c0_13 = arith.constant 0 : index
    %32 = vector.load %arg6[%c0_12, %c0_13] : memref<1x32xbf16, #tpu.memory_space<vmem>>, vector<1x32xbf16>
    %33 = arith.extf %32 : vector<1x32xbf16> to vector<1x32xf32>
    %34 = vector.broadcast %33 : vector<1x32xf32> to vector<8x32xf32>
    %35 = arith.addf %31, %34 : vector<8x32xf32>
    %36 = arith.truncf %35 : vector<8x32xf32> to vector<8x32xbf16>
    %c0_14 = arith.constant 0 : index
    %c0_15 = arith.constant 0 : index
    %c0_16 = arith.constant 0 : index
    %37 = vector.load %arg7[%c0_14, %c0_15, %c0_16] : memref<1x8x32xbf16, #tpu.memory_space<vmem>>, vector<1x8x32xbf16>
    %38 = vector.shape_cast %37 : vector<1x8x32xbf16> to vector<8x32xbf16>
    %39 = vector.shape_cast %36 : vector<8x32xbf16> to vector<1x8x32xbf16>
    tpu.vector_store %arg7[%c0_14, %c0_15, %c0_16], %39 {strides = array<i32>} : memref<1x8x32xbf16, #tpu.memory_space<vmem>>, vector<1x8x32xbf16>,
    return
  }
  func.func @transform_0(%arg0: i32, %arg1: i32) -> (i32, i32, i32) {
    %c0_i32 = arith.constant 0 : i32
    %c0_i32_0 = arith.constant 0 : i32
    return %arg0, %arg1, %c0_i32 : i32, i32, i32
  }
  func.func @transform_1(%arg0: i32, %arg1: i32) -> (i32, i32) {
    %c0_i32 = arith.constant 0 : i32
    %c0_i32_0 = arith.constant 0 : i32
    return %arg1, %c0_i32 : i32, i32
  }
  func.func @transform_2(%arg0: i32, %arg1: i32) -> (i32, i32) {
    %c0_i32 = arith.constant 0 : i32
    %c0_i32_0 = arith.constant 0 : i32
    %c0_i32_1 = arith.constant 0 : i32
    return %c0_i32, %c0_i32_0 : i32, i32
  }
  func.func @transform_3(%arg0: i32, %arg1: i32) -> (i32, i32) {
    %c0_i32 = arith.constant 0 : i32
    %c0_i32_0 = arith.constant 0 : i32
    %c0_i32_1 = arith.constant 0 : i32
    return %c0_i32, %c0_i32_0 : i32, i32
  }
  func.func @transform_4(%arg0: i32, %arg1: i32) -> (i32, i32) {
    %c0_i32 = arith.constant 0 : i32
    %c0_i32_0 = arith.constant 0 : i32
    %c0_i32_1 = arith.constant 0 : i32
    return %c0_i32, %c0_i32_0 : i32, i32
  }
  func.func @transform_5(%arg0: i32, %arg1: i32) -> (i32, i32, i32) {
    %c0_i32 = arith.constant 0 : i32
    %c0_i32_0 = arith.constant 0 : i32
    return %arg0, %arg1, %c0_i32 : i32, i32, i32
  }
}

module attributes {stable_mosaic.version = 11 : i64} {
  func.func @_matmul_kernel(%arg0: i32, %arg1: i32, %arg2: i32, %arg3: memref<16x32xbf16, #tpu.memory_space<vmem>>, %arg4: memref<32x96xbf16, #tpu.memory_space<vmem>>, %arg5: memref<1x96xbf16, #tpu.memory_space<vmem>>, %arg6: memref<16x96xbf16, #tpu.memory_space<vmem>>, %arg7: memref<16x96xf32, #tpu.memory_space<vmem>>) attributes {dimension_semantics = [#tpu.dimension_semantics<parallel>, #tpu.dimension_semantics<parallel>, #tpu.dimension_semantics<arbitrary>], iteration_bounds = array<i64: 1, 1, 1>, scalar_prefetch = 0 : i64, scratch_operands = 1 : i64, tpu.core_type = #tpu.core_type<tc>, window_params = [{transform_indices = @transform_0, window_bounds = array<i64: 16, 32>}, {transform_indices = @transform_1, window_bounds = array<i64: 32, 96>}, {transform_indices = @transform_2, window_bounds = array<i64: 1, 96>}, {transform_indices = @transform_3, window_bounds = array<i64: 16, 96>}]} {
    %c0_i32 = arith.constant 0 : i32
    %0 = arith.cmpi eq, %arg2, %c0_i32 : i32
    %1 = arith.extui %0 : i1 to i32
    %c0_i32_0 = arith.constant 0 : i32
    %2 = arith.cmpi ne, %1, %c0_i32_0 : i32
    scf.if %2 {
      %cst_10 = arith.constant 0.000000e+00 : f32
      %12 = vector.broadcast %cst_10 : f32 to vector<16x96xf32>
      %c0_11 = arith.constant 0 : index
      %c0_12 = arith.constant 0 : index
      %13 = vector.load %arg7[%c0_11, %c0_12] : memref<16x96xf32, #tpu.memory_space<vmem>>, vector<16x96xf32>
      tpu.vector_store %arg7[%c0_11, %c0_12], %12 {strides = array<i32>} : memref<16x96xf32, #tpu.memory_space<vmem>>, vector<16x96xf32>,
    } else {
    }
    %c0 = arith.constant 0 : index
    %c0_1 = arith.constant 0 : index
    %3 = vector.load %arg7[%c0, %c0_1] : memref<16x96xf32, #tpu.memory_space<vmem>>, vector<16x96xf32>
    %c0_2 = arith.constant 0 : index
    %c0_3 = arith.constant 0 : index
    %4 = vector.load %arg3[%c0_2, %c0_3] : memref<16x32xbf16, #tpu.memory_space<vmem>>, vector<16x32xbf16>
    %c0_4 = arith.constant 0 : index
    %c0_5 = arith.constant 0 : index
    %5 = vector.load %arg4[%c0_4, %c0_5] : memref<32x96xbf16, #tpu.memory_space<vmem>>, vector<32x96xbf16>
    %cst = arith.constant dense<0.000000e+00> : vector<16x96xf32>
    %6 = tpu.matmul %4, %5, %cst {dimension_numbers = #tpu.dot_dimension_numbers<[1], [0], [0], [1], [0, 0, 1, 1], [], []>} : vector<16x32xbf16>, vector<32x96xbf16>, vector<16x96xf32> -> vector<16x96xf32>
    %7 = arith.addf %3, %6 : vector<16x96xf32>
    %c0_6 = arith.constant 0 : index
    %c0_7 = arith.constant 0 : index
    %8 = vector.load %arg7[%c0_6, %c0_7] : memref<16x96xf32, #tpu.memory_space<vmem>>, vector<16x96xf32>
    tpu.vector_store %arg7[%c0_6, %c0_7], %7 {strides = array<i32>} : memref<16x96xf32, #tpu.memory_space<vmem>>, vector<16x96xf32>,
    %c0_i32_8 = arith.constant 0 : i32
    %9 = arith.cmpi eq, %arg2, %c0_i32_8 : i32
    %10 = arith.extui %9 : i1 to i32
    %c0_i32_9 = arith.constant 0 : i32
    %11 = arith.cmpi ne, %10, %c0_i32_9 : i32
    scf.if %11 {
      %c0_10 = arith.constant 0 : index
      %c0_11 = arith.constant 0 : index
      %12 = vector.load %arg7[%c0_10, %c0_11] : memref<16x96xf32, #tpu.memory_space<vmem>>, vector<16x96xf32>
      %c0_12 = arith.constant 0 : index
      %c0_13 = arith.constant 0 : index
      %13 = vector.load %arg5[%c0_12, %c0_13] : memref<1x96xbf16, #tpu.memory_space<vmem>>, vector<1x96xbf16>
      %14 = arith.extf %13 : vector<1x96xbf16> to vector<1x96xf32>
      %15 = vector.broadcast %14 : vector<1x96xf32> to vector<16x96xf32>
      %16 = arith.addf %12, %15 : vector<16x96xf32>
      %17 = arith.truncf %16 : vector<16x96xf32> to vector<16x96xbf16>
      %c0_14 = arith.constant 0 : index
      %c0_15 = arith.constant 0 : index
      %18 = vector.load %arg6[%c0_14, %c0_15] : memref<16x96xbf16, #tpu.memory_space<vmem>>, vector<16x96xbf16>
      tpu.vector_store %arg6[%c0_14, %c0_15], %17 {strides = array<i32>} : memref<16x96xbf16, #tpu.memory_space<vmem>>, vector<16x96xbf16>,
    } else {
    }
    return
  }
  func.func @transform_0(%arg0: i32, %arg1: i32, %arg2: i32) -> (i32, i32) {
    %c0_i32 = arith.constant 0 : i32
    return %arg0, %arg2 : i32, i32
  }
  func.func @transform_1(%arg0: i32, %arg1: i32, %arg2: i32) -> (i32, i32) {
    %c0_i32 = arith.constant 0 : i32
    return %arg2, %arg1 : i32, i32
  }
  func.func @transform_2(%arg0: i32, %arg1: i32, %arg2: i32) -> (i32, i32) {
    %c0_i32 = arith.constant 0 : i32
    %c0_i32_0 = arith.constant 0 : i32
    return %c0_i32, %arg1 : i32, i32
  }
  func.func @transform_3(%arg0: i32, %arg1: i32, %arg2: i32) -> (i32, i32) {
    %c0_i32 = arith.constant 0 : i32
    return %arg0, %arg1 : i32, i32
  }
}

module attributes {stable_mosaic.version = 11 : i64} {
  func.func @_attn_kernel_allheads(%arg0: i32, %arg1: memref<1x8x96xbf16, #tpu.memory_space<vmem>>, %arg2: memref<1x1x8xf32, #tpu.memory_space<vmem>>, %arg3: memref<1x8x32xbf16, #tpu.memory_space<vmem>>) attributes {dimension_semantics = [#tpu.dimension_semantics<parallel>], iteration_bounds = array<i64: 2>, scalar_prefetch = 0 : i64, scratch_operands = 0 : i64, tpu.core_type = #tpu.core_type<tc>, window_params = [{transform_indices = @transform_0, window_bounds = array<i64: 1, 8, 96>}, {transform_indices = @transform_1, window_bounds = array<i64: 1, 1, 8>}, {transform_indices = @transform_2, window_bounds = array<i64: 1, 8, 32>}]} {
    %c0 = arith.constant 0 : index
    %c0_0 = arith.constant 0 : index
    %c0_1 = arith.constant 0 : index
    %0 = vector.load %arg2[%c0, %c0_0, %c0_1] : memref<1x1x8xf32, #tpu.memory_space<vmem>>, vector<1x1x8xf32>
    %1 = vector.shape_cast %0 : vector<1x1x8xf32> to vector<1x8xf32>
    %c0_2 = arith.constant 0 : index
    %c0_3 = arith.constant 0 : index
    %c0_4 = arith.constant 0 : index
    %2 = vector.load %arg1[%c0_2, %c0_3, %c0_4] : memref<1x8x96xbf16, #tpu.memory_space<vmem>>, vector<1x8x16xbf16>
    %3 = vector.shape_cast %2 : vector<1x8x16xbf16> to vector<8x16xbf16>
    %cst = arith.constant 2.500000e-01 : bf16
    %4 = vector.broadcast %cst : bf16 to vector<8x16xbf16>
    %5 = arith.mulf %3, %4 : vector<8x16xbf16>
    %c0_5 = arith.constant 0 : index
    %c0_6 = arith.constant 0 : index
    %c32 = arith.constant 32 : index
    %6 = vector.load %arg1[%c0_5, %c0_6, %c32] : memref<1x8x96xbf16, #tpu.memory_space<vmem>>, vector<1x8x16xbf16>
    %7 = vector.shape_cast %6 : vector<1x8x16xbf16> to vector<8x16xbf16>
    %c0_7 = arith.constant 0 : index
    %c0_8 = arith.constant 0 : index
    %c64 = arith.constant 64 : index
    %8 = vector.load %arg1[%c0_7, %c0_8, %c64] : memref<1x8x96xbf16, #tpu.memory_space<vmem>>, vector<1x8x16xbf16>
    %9 = vector.shape_cast %8 : vector<1x8x16xbf16> to vector<8x16xbf16>
    %cst_9 = arith.constant dense<0.000000e+00> : vector<8x8xf32>
    %10 = tpu.matmul %5, %7, %cst_9 {dimension_numbers = #tpu.dot_dimension_numbers<[1], [1], [0], [0], [0, 0, 1, 0], [], []>} : vector<8x16xbf16>, vector<8x16xbf16>, vector<8x8xf32> -> vector<8x8xf32>
    %11 = vector.broadcast %1 : vector<1x8xf32> to vector<8x8xf32>
    %12 = arith.addf %10, %11 : vector<8x8xf32>
    %cst_10 = arith.constant dense<0xFF800000> : vector<8xf32>
    %13 = vector.multi_reduction <maximumf>, %12, %cst_10 [1] : vector<8x8xf32> to vector<8xf32>
    %14 = vector.shape_cast %13 : vector<8xf32> to vector<8x1xf32>
    %15 = vector.broadcast %14 : vector<8x1xf32> to vector<8x8xf32>
    %16 = arith.subf %12, %15 : vector<8x8xf32>
    %17 = math.exp %16 : vector<8x8xf32>
    %cst_11 = arith.constant dense<0.000000e+00> : vector<8xf32>
    %18 = vector.multi_reduction <add>, %17, %cst_11 [1] : vector<8x8xf32> to vector<8xf32>
    %19 = vector.shape_cast %18 : vector<8xf32> to vector<8x1xf32>
    %20 = tpu.reciprocal %19 {approx = true} : vector<8x1xf32> -> vector<8x1xf32>
    %21 = arith.truncf %17 : vector<8x8xf32> to vector<8x8xbf16>
    %cst_12 = arith.constant dense<0.000000e+00> : vector<8x16xf32>
    %22 = tpu.matmul %21, %9, %cst_12 {dimension_numbers = #tpu.dot_dimension_numbers<[1], [0], [0], [1], [0, 0, 1, 1], [], []>} : vector<8x8xbf16>, vector<8x16xbf16>, vector<8x16xf32> -> vector<8x16xf32>
    %23 = vector.broadcast %20 : vector<8x1xf32> to vector<8x16xf32>
    %24 = arith.mulf %22, %23 : vector<8x16xf32>
    %c0_13 = arith.constant 0 : index
    %c0_14 = arith.constant 0 : index
    %c16 = arith.constant 16 : index
    %25 = vector.load %arg1[%c0_13, %c0_14, %c16] : memref<1x8x96xbf16, #tpu.memory_space<vmem>>, vector<1x8x16xbf16>
    %26 = vector.shape_cast %25 : vector<1x8x16xbf16> to vector<8x16xbf16>
    %cst_15 = arith.constant 2.500000e-01 : bf16
    %27 = vector.broadcast %cst_15 : bf16 to vector<8x16xbf16>
    %28 = arith.mulf %26, %27 : vector<8x16xbf16>
    %c0_16 = arith.constant 0 : index
    %c0_17 = arith.constant 0 : index
    %c48 = arith.constant 48 : index
    %29 = vector.load %arg1[%c0_16, %c0_17, %c48] : memref<1x8x96xbf16, #tpu.memory_space<vmem>>, vector<1x8x16xbf16>
    %30 = vector.shape_cast %29 : vector<1x8x16xbf16> to vector<8x16xbf16>
    %c0_18 = arith.constant 0 : index
    %c0_19 = arith.constant 0 : index
    %c80 = arith.constant 80 : index
    %31 = vector.load %arg1[%c0_18, %c0_19, %c80] : memref<1x8x96xbf16, #tpu.memory_space<vmem>>, vector<1x8x16xbf16>
    %32 = vector.shape_cast %31 : vector<1x8x16xbf16> to vector<8x16xbf16>
    %cst_20 = arith.constant dense<0.000000e+00> : vector<8x8xf32>
    %33 = tpu.matmul %28, %30, %cst_20 {dimension_numbers = #tpu.dot_dimension_numbers<[1], [1], [0], [0], [0, 0, 1, 0], [], []>} : vector<8x16xbf16>, vector<8x16xbf16>, vector<8x8xf32> -> vector<8x8xf32>
    %34 = vector.broadcast %1 : vector<1x8xf32> to vector<8x8xf32>
    %35 = arith.addf %33, %34 : vector<8x8xf32>
    %cst_21 = arith.constant dense<0xFF800000> : vector<8xf32>
    %36 = vector.multi_reduction <maximumf>, %35, %cst_21 [1] : vector<8x8xf32> to vector<8xf32>
    %37 = vector.shape_cast %36 : vector<8xf32> to vector<8x1xf32>
    %38 = vector.broadcast %37 : vector<8x1xf32> to vector<8x8xf32>
    %39 = arith.subf %35, %38 : vector<8x8xf32>
    %40 = math.exp %39 : vector<8x8xf32>
    %cst_22 = arith.constant dense<0.000000e+00> : vector<8xf32>
    %41 = vector.multi_reduction <add>, %40, %cst_22 [1] : vector<8x8xf32> to vector<8xf32>
    %42 = vector.shape_cast %41 : vector<8xf32> to vector<8x1xf32>
    %43 = tpu.reciprocal %42 {approx = true} : vector<8x1xf32> -> vector<8x1xf32>
    %44 = arith.truncf %40 : vector<8x8xf32> to vector<8x8xbf16>
    %cst_23 = arith.constant dense<0.000000e+00> : vector<8x16xf32>
    %45 = tpu.matmul %44, %32, %cst_23 {dimension_numbers = #tpu.dot_dimension_numbers<[1], [0], [0], [1], [0, 0, 1, 1], [], []>} : vector<8x8xbf16>, vector<8x16xbf16>, vector<8x16xf32> -> vector<8x16xf32>
    %46 = vector.broadcast %43 : vector<8x1xf32> to vector<8x16xf32>
    %47 = arith.mulf %45, %46 : vector<8x16xf32>
    %48 = tpu.concatenate %24, %47 in 1 : vector<8x16xf32>, vector<8x16xf32> -> vector<8x32xf32>
    %49 = arith.truncf %48 : vector<8x32xf32> to vector<8x32xbf16>
    %c0_24 = arith.constant 0 : index
    %c0_25 = arith.constant 0 : index
    %c0_26 = arith.constant 0 : index
    %50 = vector.load %arg3[%c0_24, %c0_25, %c0_26] : memref<1x8x32xbf16, #tpu.memory_space<vmem>>, vector<1x8x32xbf16>
    %51 = vector.shape_cast %50 : vector<1x8x32xbf16> to vector<8x32xbf16>
    %52 = vector.shape_cast %49 : vector<8x32xbf16> to vector<1x8x32xbf16>
    tpu.vector_store %arg3[%c0_24, %c0_25, %c0_26], %52 {strides = array<i32>} : memref<1x8x32xbf16, #tpu.memory_space<vmem>>, vector<1x8x32xbf16>,
    return
  }
  func.func @transform_0(%arg0: i32) -> (i32, i32, i32) {
    %c0_i32 = arith.constant 0 : i32
    %c0_i32_0 = arith.constant 0 : i32
    %c0_i32_1 = arith.constant 0 : i32
    return %arg0, %c0_i32, %c0_i32_0 : i32, i32, i32
  }
  func.func @transform_1(%arg0: i32) -> (i32, i32, i32) {
    %c0_i32 = arith.constant 0 : i32
    %c0_i32_0 = arith.constant 0 : i32
    %c0_i32_1 = arith.constant 0 : i32
    return %arg0, %c0_i32, %c0_i32_0 : i32, i32, i32
  }
  func.func @transform_2(%arg0: i32) -> (i32, i32, i32) {
    %c0_i32 = arith.constant 0 : i32
    %c0_i32_0 = arith.constant 0 : i32
    %c0_i32_1 = arith.constant 0 : i32
    return %arg0, %c0_i32, %c0_i32_0 : i32, i32, i32
  }
}

module attributes {stable_mosaic.version = 11 : i64} {
  func.func @_matmul_add_ln_kernel(%arg0: i32, %arg1: i32, %arg2: memref<16x32xbf16, #tpu.memory_space<vmem>>, %arg3: memref<32x32xbf16, #tpu.memory_space<vmem>>, %arg4: memref<1x32xbf16, #tpu.memory_space<vmem>>, %arg5: memref<16x32xbf16, #tpu.memory_space<vmem>>, %arg6: memref<1x32xbf16, #tpu.memory_space<vmem>>, %arg7: memref<1x32xbf16, #tpu.memory_space<vmem>>, %arg8: memref<16x32xbf16, #tpu.memory_space<vmem>>, %arg9: memref<16x32xf32, #tpu.memory_space<vmem>>) attributes {dimension_semantics = [#tpu.dimension_semantics<parallel>, #tpu.dimension_semantics<arbitrary>], iteration_bounds = array<i64: 1, 1>, scalar_prefetch = 0 : i64, scratch_operands = 1 : i64, tpu.core_type = #tpu.core_type<tc>, window_params = [{transform_indices = @transform_0, window_bounds = array<i64: 16, 32>}, {transform_indices = @transform_1, window_bounds = array<i64: 32, 32>}, {pipeline_mode = #tpu.pipeline_mode<synchronous>, transform_indices = @transform_2, window_bounds = array<i64: 1, 32>}, {transform_indices = @transform_3, window_bounds = array<i64: 16, 32>}, {pipeline_mode = #tpu.pipeline_mode<synchronous>, transform_indices = @transform_4, window_bounds = array<i64: 1, 32>}, {pipeline_mode = #tpu.pipeline_mode<synchronous>, transform_indices = @transform_5, window_bounds = array<i64: 1, 32>}, {transform_indices = @transform_6, window_bounds = array<i64: 16, 32>}]} {
    %c0_i32 = arith.constant 0 : i32
    %0 = arith.cmpi eq, %arg1, %c0_i32 : i32
    %1 = arith.extui %0 : i1 to i32
    %c0_i32_0 = arith.constant 0 : i32
    %2 = arith.cmpi ne, %1, %c0_i32_0 : i32
    scf.if %2 {
      %cst_10 = arith.constant 0.000000e+00 : f32
      %12 = vector.broadcast %cst_10 : f32 to vector<16x32xf32>
      %c0_11 = arith.constant 0 : index
      %c0_12 = arith.constant 0 : index
      %13 = vector.load %arg9[%c0_11, %c0_12] : memref<16x32xf32, #tpu.memory_space<vmem>>, vector<16x32xf32>
      tpu.vector_store %arg9[%c0_11, %c0_12], %12 {strides = array<i32>} : memref<16x32xf32, #tpu.memory_space<vmem>>, vector<16x32xf32>,
    } else {
    }
    %c0 = arith.constant 0 : index
    %c0_1 = arith.constant 0 : index
    %3 = vector.load %arg9[%c0, %c0_1] : memref<16x32xf32, #tpu.memory_space<vmem>>, vector<16x32xf32>
    %c0_2 = arith.constant 0 : index
    %c0_3 = arith.constant 0 : index
    %4 = vector.load %arg2[%c0_2, %c0_3] : memref<16x32xbf16, #tpu.memory_space<vmem>>, vector<16x32xbf16>
    %c0_4 = arith.constant 0 : index
    %c0_5 = arith.constant 0 : index
    %5 = vector.load %arg3[%c0_4, %c0_5] : memref<32x32xbf16, #tpu.memory_space<vmem>>, vector<32x32xbf16>
    %cst = arith.constant dense<0.000000e+00> : vector<16x32xf32>
    %6 = tpu.matmul %4, %5, %cst {dimension_numbers = #tpu.dot_dimension_numbers<[1], [0], [0], [1], [0, 0, 1, 1], [], []>} : vector<16x32xbf16>, vector<32x32xbf16>, vector<16x32xf32> -> vector<16x32xf32>
    %7 = arith.addf %3, %6 : vector<16x32xf32>
    %c0_6 = arith.constant 0 : index
    %c0_7 = arith.constant 0 : index
    %8 = vector.load %arg9[%c0_6, %c0_7] : memref<16x32xf32, #tpu.memory_space<vmem>>, vector<16x32xf32>
    tpu.vector_store %arg9[%c0_6, %c0_7], %7 {strides = array<i32>} : memref<16x32xf32, #tpu.memory_space<vmem>>, vector<16x32xf32>,
    %c0_i32_8 = arith.constant 0 : i32
    %9 = arith.cmpi eq, %arg1, %c0_i32_8 : i32
    %10 = arith.extui %9 : i1 to i32
    %c0_i32_9 = arith.constant 0 : i32
    %11 = arith.cmpi ne, %10, %c0_i32_9 : i32
    scf.if %11 {
      %c0_10 = arith.constant 0 : index
      %c0_11 = arith.constant 0 : index
      %12 = vector.load %arg9[%c0_10, %c0_11] : memref<16x32xf32, #tpu.memory_space<vmem>>, vector<16x32xf32>
      %c0_12 = arith.constant 0 : index
      %c0_13 = arith.constant 0 : index
      %13 = vector.load %arg4[%c0_12, %c0_13] : memref<1x32xbf16, #tpu.memory_space<vmem>>, vector<1x32xbf16>
      %14 = arith.extf %13 : vector<1x32xbf16> to vector<1x32xf32>
      %15 = vector.broadcast %14 : vector<1x32xf32> to vector<16x32xf32>
      %16 = arith.addf %12, %15 : vector<16x32xf32>
      %c0_14 = arith.constant 0 : index
      %c0_15 = arith.constant 0 : index
      %17 = vector.load %arg5[%c0_14, %c0_15] : memref<16x32xbf16, #tpu.memory_space<vmem>>, vector<16x32xbf16>
      %18 = arith.extf %17 : vector<16x32xbf16> to vector<16x32xf32>
      %19 = arith.addf %16, %18 : vector<16x32xf32>
      %cst_16 = arith.constant dense<0.000000e+00> : vector<16xf32>
      %20 = vector.multi_reduction <add>, %19, %cst_16 [1] : vector<16x32xf32> to vector<16xf32>
      %21 = vector.shape_cast %20 : vector<16xf32> to vector<16x1xf32>
      %cst_17 = arith.constant 3.200000e+01 : f32
      %22 = vector.broadcast %cst_17 : f32 to vector<16x1xf32>
      %23 = arith.divf %21, %22 : vector<16x1xf32>
      %24 = vector.broadcast %23 : vector<16x1xf32> to vector<16x32xf32>
      %25 = arith.subf %19, %24 : vector<16x32xf32>
      %26 = arith.mulf %25, %25 : vector<16x32xf32>
      %cst_18 = arith.constant dense<0.000000e+00> : vector<16xf32>
      %27 = vector.multi_reduction <add>, %26, %cst_18 [1] : vector<16x32xf32> to vector<16xf32>
      %28 = vector.shape_cast %27 : vector<16xf32> to vector<16x1xf32>
      %cst_19 = arith.constant 3.200000e+01 : f32
      %29 = vector.broadcast %cst_19 : f32 to vector<16x1xf32>
      %30 = arith.divf %28, %29 : vector<16x1xf32>
      %31 = vector.broadcast %23 : vector<16x1xf32> to vector<16x32xf32>
      %32 = arith.subf %19, %31 : vector<16x32xf32>
      %cst_20 = arith.constant 9.99999996E-13 : f32
      %33 = vector.broadcast %cst_20 : f32 to vector<16x1xf32>
      %34 = arith.addf %30, %33 : vector<16x1xf32>
      %35 = math.rsqrt %34 : vector<16x1xf32>
      %36 = vector.broadcast %35 : vector<16x1xf32> to vector<16x32xf32>
      %37 = arith.mulf %32, %36 : vector<16x32xf32>
      %c0_21 = arith.constant 0 : index
      %c0_22 = arith.constant 0 : index
      %38 = vector.load %arg6[%c0_21, %c0_22] : memref<1x32xbf16, #tpu.memory_space<vmem>>, vector<1x32xbf16>
      %39 = arith.extf %38 : vector<1x32xbf16> to vector<1x32xf32>
      %40 = vector.broadcast %39 : vector<1x32xf32> to vector<16x32xf32>
      %41 = arith.mulf %37, %40 : vector<16x32xf32>
      %c0_23 = arith.constant 0 : index
      %c0_24 = arith.constant 0 : index
      %42 = vector.load %arg7[%c0_23, %c0_24] : memref<1x32xbf16, #tpu.memory_space<vmem>>, vector<1x32xbf16>
      %43 = arith.extf %42 : vector<1x32xbf16> to vector<1x32xf32>
      %44 = vector.broadcast %43 : vector<1x32xf32> to vector<16x32xf32>
      %45 = arith.addf %41, %44 : vector<16x32xf32>
      %46 = arith.truncf %45 : vector<16x32xf32> to vector<16x32xbf16>
      %c0_25 = arith.constant 0 : index
      %c0_26 = arith.constant 0 : index
      %47 = vector.load %arg8[%c0_25, %c0_26] : memref<16x32xbf16, #tpu.memory_space<vmem>>, vector<16x32xbf16>
      tpu.vector_store %arg8[%c0_25, %c0_26], %46 {strides = array<i32>} : memref<16x32xbf16, #tpu.memory_space<vmem>>, vector<16x32xbf16>,
    } else {
    }
    return
  }
  func.func @transform_0(%arg0: i32, %arg1: i32) -> (i32, i32) {
    %c0_i32 = arith.constant 0 : i32
    return %arg0, %arg1 : i32, i32
  }
  func.func @transform_1(%arg0: i32, %arg1: i32) -> (i32, i32) {
    %c0_i32 = arith.constant 0 : i32
    %c0_i32_0 = arith.constant 0 : i32
    return %arg1, %c0_i32 : i32, i32
  }
  func.func @transform_2(%arg0: i32, %arg1: i32) -> (i32, i32) {
    %c0_i32 = arith.constant 0 : i32
    %c0_i32_0 = arith.constant 0 : i32
    %c0_i32_1 = arith.constant 0 : i32
    return %c0_i32, %c0_i32_0 : i32, i32
  }
  func.func @transform_3(%arg0: i32, %arg1: i32) -> (i32, i32) {
    %c0_i32 = arith.constant 0 : i32
    %c0_i32_0 = arith.constant 0 : i32
    return %arg0, %c0_i32 : i32, i32
  }
  func.func @transform_4(%arg0: i32, %arg1: i32) -> (i32, i32) {
    %c0_i32 = arith.constant 0 : i32
    %c0_i32_0 = arith.constant 0 : i32
    %c0_i32_1 = arith.constant 0 : i32
    return %c0_i32, %c0_i32_0 : i32, i32
  }
  func.func @transform_5(%arg0: i32, %arg1: i32) -> (i32, i32) {
    %c0_i32 = arith.constant 0 : i32
    %c0_i32_0 = arith.constant 0 : i32
    %c0_i32_1 = arith.constant 0 : i32
    return %c0_i32, %c0_i32_0 : i32, i32
  }
  func.func @transform_6(%arg0: i32, %arg1: i32) -> (i32, i32) {
    %c0_i32 = arith.constant 0 : i32
    %c0_i32_0 = arith.constant 0 : i32
    return %arg0, %c0_i32 : i32, i32
  }
}

module attributes {stable_mosaic.version = 11 : i64} {
  func.func @_matmul_kernel(%arg0: i32, %arg1: i32, %arg2: i32, %arg3: memref<16x32xbf16, #tpu.memory_space<vmem>>, %arg4: memref<32x64xbf16, #tpu.memory_space<vmem>>, %arg5: memref<1x64xbf16, #tpu.memory_space<vmem>>, %arg6: memref<16x64xbf16, #tpu.memory_space<vmem>>, %arg7: memref<16x64xf32, #tpu.memory_space<vmem>>) attributes {dimension_semantics = [#tpu.dimension_semantics<parallel>, #tpu.dimension_semantics<parallel>, #tpu.dimension_semantics<arbitrary>], iteration_bounds = array<i64: 1, 1, 1>, scalar_prefetch = 0 : i64, scratch_operands = 1 : i64, tpu.core_type = #tpu.core_type<tc>, window_params = [{transform_indices = @transform_0, window_bounds = array<i64: 16, 32>}, {transform_indices = @transform_1, window_bounds = array<i64: 32, 64>}, {transform_indices = @transform_2, window_bounds = array<i64: 1, 64>}, {transform_indices = @transform_3, window_bounds = array<i64: 16, 64>}]} {
    %c0_i32 = arith.constant 0 : i32
    %0 = arith.cmpi eq, %arg2, %c0_i32 : i32
    %1 = arith.extui %0 : i1 to i32
    %c0_i32_0 = arith.constant 0 : i32
    %2 = arith.cmpi ne, %1, %c0_i32_0 : i32
    scf.if %2 {
      %cst_10 = arith.constant 0.000000e+00 : f32
      %12 = vector.broadcast %cst_10 : f32 to vector<16x64xf32>
      %c0_11 = arith.constant 0 : index
      %c0_12 = arith.constant 0 : index
      %13 = vector.load %arg7[%c0_11, %c0_12] : memref<16x64xf32, #tpu.memory_space<vmem>>, vector<16x64xf32>
      tpu.vector_store %arg7[%c0_11, %c0_12], %12 {strides = array<i32>} : memref<16x64xf32, #tpu.memory_space<vmem>>, vector<16x64xf32>,
    } else {
    }
    %c0 = arith.constant 0 : index
    %c0_1 = arith.constant 0 : index
    %3 = vector.load %arg7[%c0, %c0_1] : memref<16x64xf32, #tpu.memory_space<vmem>>, vector<16x64xf32>
    %c0_2 = arith.constant 0 : index
    %c0_3 = arith.constant 0 : index
    %4 = vector.load %arg3[%c0_2, %c0_3] : memref<16x32xbf16, #tpu.memory_space<vmem>>, vector<16x32xbf16>
    %c0_4 = arith.constant 0 : index
    %c0_5 = arith.constant 0 : index
    %5 = vector.load %arg4[%c0_4, %c0_5] : memref<32x64xbf16, #tpu.memory_space<vmem>>, vector<32x64xbf16>
    %cst = arith.constant dense<0.000000e+00> : vector<16x64xf32>
    %6 = tpu.matmul %4, %5, %cst {dimension_numbers = #tpu.dot_dimension_numbers<[1], [0], [0], [1], [0, 0, 1, 1], [], []>} : vector<16x32xbf16>, vector<32x64xbf16>, vector<16x64xf32> -> vector<16x64xf32>
    %7 = arith.addf %3, %6 : vector<16x64xf32>
    %c0_6 = arith.constant 0 : index
    %c0_7 = arith.constant 0 : index
    %8 = vector.load %arg7[%c0_6, %c0_7] : memref<16x64xf32, #tpu.memory_space<vmem>>, vector<16x64xf32>
    tpu.vector_store %arg7[%c0_6, %c0_7], %7 {strides = array<i32>} : memref<16x64xf32, #tpu.memory_space<vmem>>, vector<16x64xf32>,
    %c0_i32_8 = arith.constant 0 : i32
    %9 = arith.cmpi eq, %arg2, %c0_i32_8 : i32
    %10 = arith.extui %9 : i1 to i32
    %c0_i32_9 = arith.constant 0 : i32
    %11 = arith.cmpi ne, %10, %c0_i32_9 : i32
    scf.if %11 {
      %c0_10 = arith.constant 0 : index
      %c0_11 = arith.constant 0 : index
      %12 = vector.load %arg7[%c0_10, %c0_11] : memref<16x64xf32, #tpu.memory_space<vmem>>, vector<16x64xf32>
      %c0_12 = arith.constant 0 : index
      %c0_13 = arith.constant 0 : index
      %13 = vector.load %arg5[%c0_12, %c0_13] : memref<1x64xbf16, #tpu.memory_space<vmem>>, vector<1x64xbf16>
      %14 = arith.extf %13 : vector<1x64xbf16> to vector<1x64xf32>
      %15 = vector.broadcast %14 : vector<1x64xf32> to vector<16x64xf32>
      %16 = arith.addf %12, %15 : vector<16x64xf32>
      %17 = arith.mulf %16, %16 : vector<16x64xf32>
      %18 = arith.mulf %16, %17 : vector<16x64xf32>
      %cst_14 = arith.constant 4.471500e-02 : f32
      %19 = vector.broadcast %cst_14 : f32 to vector<16x64xf32>
      %20 = arith.mulf %19, %18 : vector<16x64xf32>
      %21 = arith.addf %16, %20 : vector<16x64xf32>
      %cst_15 = arith.constant 0.797884583 : f32
      %22 = vector.broadcast %cst_15 : f32 to vector<16x64xf32>
      %23 = arith.mulf %22, %21 : vector<16x64xf32>
      %24 = math.tanh %23 : vector<16x64xf32>
      %cst_16 = arith.constant 1.000000e+00 : f32
      %25 = vector.broadcast %cst_16 : f32 to vector<16x64xf32>
      %26 = arith.addf %25, %24 : vector<16x64xf32>
      %cst_17 = arith.constant 5.000000e-01 : f32
      %27 = vector.broadcast %cst_17 : f32 to vector<16x64xf32>
      %28 = arith.mulf %27, %26 : vector<16x64xf32>
      %29 = arith.mulf %16, %28 : vector<16x64xf32>
      %30 = arith.truncf %29 : vector<16x64xf32> to vector<16x64xbf16>
      %c0_18 = arith.constant 0 : index
      %c0_19 = arith.constant 0 : index
      %31 = vector.load %arg6[%c0_18, %c0_19] : memref<16x64xbf16, #tpu.memory_space<vmem>>, vector<16x64xbf16>
      tpu.vector_store %arg6[%c0_18, %c0_19], %30 {strides = array<i32>} : memref<16x64xbf16, #tpu.memory_space<vmem>>, vector<16x64xbf16>,
    } else {
    }
    return
  }
  func.func @transform_0(%arg0: i32, %arg1: i32, %arg2: i32) -> (i32, i32) {
    %c0_i32 = arith.constant 0 : i32
    return %arg0, %arg2 : i32, i32
  }
  func.func @transform_1(%arg0: i32, %arg1: i32, %arg2: i32) -> (i32, i32) {
    %c0_i32 = arith.constant 0 : i32
    return %arg2, %arg1 : i32, i32
  }
  func.func @transform_2(%arg0: i32, %arg1: i32, %arg2: i32) -> (i32, i32) {
    %c0_i32 = arith.constant 0 : i32
    %c0_i32_0 = arith.constant 0 : i32
    return %c0_i32, %arg1 : i32, i32
  }
  func.func @transform_3(%arg0: i32, %arg1: i32, %arg2: i32) -> (i32, i32) {
    %c0_i32 = arith.constant 0 : i32
    return %arg0, %arg1 : i32, i32
  }
}

module attributes {stable_mosaic.version = 11 : i64} {
  func.func @_matmul_add_ln_kernel(%arg0: i32, %arg1: i32, %arg2: memref<16x64xbf16, #tpu.memory_space<vmem>>, %arg3: memref<64x32xbf16, #tpu.memory_space<vmem>>, %arg4: memref<1x32xbf16, #tpu.memory_space<vmem>>, %arg5: memref<16x32xbf16, #tpu.memory_space<vmem>>, %arg6: memref<1x32xbf16, #tpu.memory_space<vmem>>, %arg7: memref<1x32xbf16, #tpu.memory_space<vmem>>, %arg8: memref<16x32xbf16, #tpu.memory_space<vmem>>, %arg9: memref<16x32xf32, #tpu.memory_space<vmem>>) attributes {dimension_semantics = [#tpu.dimension_semantics<parallel>, #tpu.dimension_semantics<arbitrary>], iteration_bounds = array<i64: 1, 1>, scalar_prefetch = 0 : i64, scratch_operands = 1 : i64, tpu.core_type = #tpu.core_type<tc>, window_params = [{transform_indices = @transform_0, window_bounds = array<i64: 16, 64>}, {transform_indices = @transform_1, window_bounds = array<i64: 64, 32>}, {pipeline_mode = #tpu.pipeline_mode<synchronous>, transform_indices = @transform_2, window_bounds = array<i64: 1, 32>}, {transform_indices = @transform_3, window_bounds = array<i64: 16, 32>}, {pipeline_mode = #tpu.pipeline_mode<synchronous>, transform_indices = @transform_4, window_bounds = array<i64: 1, 32>}, {pipeline_mode = #tpu.pipeline_mode<synchronous>, transform_indices = @transform_5, window_bounds = array<i64: 1, 32>}, {transform_indices = @transform_6, window_bounds = array<i64: 16, 32>}]} {
    %c0_i32 = arith.constant 0 : i32
    %0 = arith.cmpi eq, %arg1, %c0_i32 : i32
    %1 = arith.extui %0 : i1 to i32
    %c0_i32_0 = arith.constant 0 : i32
    %2 = arith.cmpi ne, %1, %c0_i32_0 : i32
    scf.if %2 {
      %cst_10 = arith.constant 0.000000e+00 : f32
      %12 = vector.broadcast %cst_10 : f32 to vector<16x32xf32>
      %c0_11 = arith.constant 0 : index
      %c0_12 = arith.constant 0 : index
      %13 = vector.load %arg9[%c0_11, %c0_12] : memref<16x32xf32, #tpu.memory_space<vmem>>, vector<16x32xf32>
      tpu.vector_store %arg9[%c0_11, %c0_12], %12 {strides = array<i32>} : memref<16x32xf32, #tpu.memory_space<vmem>>, vector<16x32xf32>,
    } else {
    }
    %c0 = arith.constant 0 : index
    %c0_1 = arith.constant 0 : index
    %3 = vector.load %arg9[%c0, %c0_1] : memref<16x32xf32, #tpu.memory_space<vmem>>, vector<16x32xf32>
    %c0_2 = arith.constant 0 : index
    %c0_3 = arith.constant 0 : index
    %4 = vector.load %arg2[%c0_2, %c0_3] : memref<16x64xbf16, #tpu.memory_space<vmem>>, vector<16x64xbf16>
    %c0_4 = arith.constant 0 : index
    %c0_5 = arith.constant 0 : index
    %5 = vector.load %arg3[%c0_4, %c0_5] : memref<64x32xbf16, #tpu.memory_space<vmem>>, vector<64x32xbf16>
    %cst = arith.constant dense<0.000000e+00> : vector<16x32xf32>
    %6 = tpu.matmul %4, %5, %cst {dimension_numbers = #tpu.dot_dimension_numbers<[1], [0], [0], [1], [0, 0, 1, 1], [], []>} : vector<16x64xbf16>, vector<64x32xbf16>, vector<16x32xf32> -> vector<16x32xf32>
    %7 = arith.addf %3, %6 : vector<16x32xf32>
    %c0_6 = arith.constant 0 : index
    %c0_7 = arith.constant 0 : index
    %8 = vector.load %arg9[%c0_6, %c0_7] : memref<16x32xf32, #tpu.memory_space<vmem>>, vector<16x32xf32>
    tpu.vector_store %arg9[%c0_6, %c0_7], %7 {strides = array<i32>} : memref<16x32xf32, #tpu.memory_space<vmem>>, vector<16x32xf32>,
    %c0_i32_8 = arith.constant 0 : i32
    %9 = arith.cmpi eq, %arg1, %c0_i32_8 : i32
    %10 = arith.extui %9 : i1 to i32
    %c0_i32_9 = arith.constant 0 : i32
    %11 = arith.cmpi ne, %10, %c0_i32_9 : i32
    scf.if %11 {
      %c0_10 = arith.constant 0 : index
      %c0_11 = arith.constant 0 : index
      %12 = vector.load %arg9[%c0_10, %c0_11] : memref<16x32xf32, #tpu.memory_space<vmem>>, vector<16x32xf32>
      %c0_12 = arith.constant 0 : index
      %c0_13 = arith.constant 0 : index
      %13 = vector.load %arg4[%c0_12, %c0_13] : memref<1x32xbf16, #tpu.memory_space<vmem>>, vector<1x32xbf16>
      %14 = arith.extf %13 : vector<1x32xbf16> to vector<1x32xf32>
      %15 = vector.broadcast %14 : vector<1x32xf32> to vector<16x32xf32>
      %16 = arith.addf %12, %15 : vector<16x32xf32>
      %c0_14 = arith.constant 0 : index
      %c0_15 = arith.constant 0 : index
      %17 = vector.load %arg5[%c0_14, %c0_15] : memref<16x32xbf16, #tpu.memory_space<vmem>>, vector<16x32xbf16>
      %18 = arith.extf %17 : vector<16x32xbf16> to vector<16x32xf32>
      %19 = arith.addf %16, %18 : vector<16x32xf32>
      %cst_16 = arith.constant dense<0.000000e+00> : vector<16xf32>
      %20 = vector.multi_reduction <add>, %19, %cst_16 [1] : vector<16x32xf32> to vector<16xf32>
      %21 = vector.shape_cast %20 : vector<16xf32> to vector<16x1xf32>
      %cst_17 = arith.constant 3.200000e+01 : f32
      %22 = vector.broadcast %cst_17 : f32 to vector<16x1xf32>
      %23 = arith.divf %21, %22 : vector<16x1xf32>
      %24 = vector.broadcast %23 : vector<16x1xf32> to vector<16x32xf32>
      %25 = arith.subf %19, %24 : vector<16x32xf32>
      %26 = arith.mulf %25, %25 : vector<16x32xf32>
      %cst_18 = arith.constant dense<0.000000e+00> : vector<16xf32>
      %27 = vector.multi_reduction <add>, %26, %cst_18 [1] : vector<16x32xf32> to vector<16xf32>
      %28 = vector.shape_cast %27 : vector<16xf32> to vector<16x1xf32>
      %cst_19 = arith.constant 3.200000e+01 : f32
      %29 = vector.broadcast %cst_19 : f32 to vector<16x1xf32>
      %30 = arith.divf %28, %29 : vector<16x1xf32>
      %31 = vector.broadcast %23 : vector<16x1xf32> to vector<16x32xf32>
      %32 = arith.subf %19, %31 : vector<16x32xf32>
      %cst_20 = arith.constant 9.99999996E-13 : f32
      %33 = vector.broadcast %cst_20 : f32 to vector<16x1xf32>
      %34 = arith.addf %30, %33 : vector<16x1xf32>
      %35 = math.rsqrt %34 : vector<16x1xf32>
      %36 = vector.broadcast %35 : vector<16x1xf32> to vector<16x32xf32>
      %37 = arith.mulf %32, %36 : vector<16x32xf32>
      %c0_21 = arith.constant 0 : index
      %c0_22 = arith.constant 0 : index
      %38 = vector.load %arg6[%c0_21, %c0_22] : memref<1x32xbf16, #tpu.memory_space<vmem>>, vector<1x32xbf16>
      %39 = arith.extf %38 : vector<1x32xbf16> to vector<1x32xf32>
      %40 = vector.broadcast %39 : vector<1x32xf32> to vector<16x32xf32>
      %41 = arith.mulf %37, %40 : vector<16x32xf32>
      %c0_23 = arith.constant 0 : index
      %c0_24 = arith.constant 0 : index
      %42 = vector.load %arg7[%c0_23, %c0_24] : memref<1x32xbf16, #tpu.memory_space<vmem>>, vector<1x32xbf16>
      %43 = arith.extf %42 : vector<1x32xbf16> to vector<1x32xf32>
      %44 = vector.broadcast %43 : vector<1x32xf32> to vector<16x32xf32>
      %45 = arith.addf %41, %44 : vector<16x32xf32>
      %46 = arith.truncf %45 : vector<16x32xf32> to vector<16x32xbf16>
      %c0_25 = arith.constant 0 : index
      %c0_26 = arith.constant 0 : index
      %47 = vector.load %arg8[%c0_25, %c0_26] : memref<16x32xbf16, #tpu.memory_space<vmem>>, vector<16x32xbf16>
      tpu.vector_store %arg8[%c0_25, %c0_26], %46 {strides = array<i32>} : memref<16x32xbf16, #tpu.memory_space<vmem>>, vector<16x32xbf16>,
    } else {
    }
    return
  }
  func.func @transform_0(%arg0: i32, %arg1: i32) -> (i32, i32) {
    %c0_i32 = arith.constant 0 : i32
    return %arg0, %arg1 : i32, i32
  }
  func.func @transform_1(%arg0: i32, %arg1: i32) -> (i32, i32) {
    %c0_i32 = arith.constant 0 : i32
    %c0_i32_0 = arith.constant 0 : i32
    return %arg1, %c0_i32 : i32, i32
  }
  func.func @transform_2(%arg0: i32, %arg1: i32) -> (i32, i32) {
    %c0_i32 = arith.constant 0 : i32
    %c0_i32_0 = arith.constant 0 : i32
    %c0_i32_1 = arith.constant 0 : i32
    return %c0_i32, %c0_i32_0 : i32, i32
  }
  func.func @transform_3(%arg0: i32, %arg1: i32) -> (i32, i32) {
    %c0_i32 = arith.constant 0 : i32
    %c0_i32_0 = arith.constant 0 : i32
    return %arg0, %c0_i32 : i32, i32
  }
  func.func @transform_4(%arg0: i32, %arg1: i32) -> (i32, i32) {
    %c0_i32 = arith.constant 0 : i32
    %c0_i32_0 = arith.constant 0 : i32
    %c0_i32_1 = arith.constant 0 : i32
    return %c0_i32, %c0_i32_0 : i32, i32
  }
  func.func @transform_5(%arg0: i32, %arg1: i32) -> (i32, i32) {
    %c0_i32 = arith.constant 0 : i32
    %c0_i32_0 = arith.constant 0 : i32
    %c0_i32_1 = arith.constant 0 : i32
    return %c0_i32, %c0_i32_0 : i32, i32
  }
  func.func @transform_6(%arg0: i32, %arg1: i32) -> (i32, i32) {
    %c0_i32 = arith.constant 0 : i32
    %c0_i32_0 = arith.constant 0 : i32
    return %arg0, %c0_i32 : i32, i32
  }
}

module attributes {stable_mosaic.version = 11 : i64} {
  func.func @_pool_fc_kernel(%arg0: memref<2x32xbf16, #tpu.memory_space<vmem>>, %arg1: memref<32x32xbf16, #tpu.memory_space<vmem>>, %arg2: memref<1x32xbf16, #tpu.memory_space<vmem>>, %arg3: memref<32x128xbf16, #tpu.memory_space<vmem>>, %arg4: memref<1x128xbf16, #tpu.memory_space<vmem>>, %arg5: memref<2x128xf32, #tpu.memory_space<vmem>>) attributes {dimension_semantics = [], scalar_prefetch = 0 : i64, scratch_operands = 0 : i64, tpu.core_type = #tpu.core_type<tc>} {
    %c0 = arith.constant 0 : index
    %c0_0 = arith.constant 0 : index
    %0 = vector.load %arg0[%c0, %c0_0] : memref<2x32xbf16, #tpu.memory_space<vmem>>, vector<2x32xbf16>
    %c0_1 = arith.constant 0 : index
    %c0_2 = arith.constant 0 : index
    %1 = vector.load %arg1[%c0_1, %c0_2] : memref<32x32xbf16, #tpu.memory_space<vmem>>, vector<32x32xbf16>
    %cst = arith.constant dense<0.000000e+00> : vector<2x32xf32>
    %2 = tpu.matmul %0, %1, %cst {dimension_numbers = #tpu.dot_dimension_numbers<[1], [0], [0], [1], [0, 0, 1, 1], [], []>} : vector<2x32xbf16>, vector<32x32xbf16>, vector<2x32xf32> -> vector<2x32xf32>
    %c0_3 = arith.constant 0 : index
    %c0_4 = arith.constant 0 : index
    %3 = vector.load %arg2[%c0_3, %c0_4] : memref<1x32xbf16, #tpu.memory_space<vmem>>, vector<1x32xbf16>
    %4 = arith.extf %3 : vector<1x32xbf16> to vector<1x32xf32>
    %5 = vector.broadcast %4 : vector<1x32xf32> to vector<2x32xf32>
    %6 = arith.addf %2, %5 : vector<2x32xf32>
    %7 = math.tanh %6 : vector<2x32xf32>
    %8 = arith.truncf %7 : vector<2x32xf32> to vector<2x32xbf16>
    %c0_5 = arith.constant 0 : index
    %c0_6 = arith.constant 0 : index
    %9 = vector.load %arg3[%c0_5, %c0_6] : memref<32x128xbf16, #tpu.memory_space<vmem>>, vector<32x128xbf16>
    %cst_7 = arith.constant dense<0.000000e+00> : vector<2x128xf32>
    %10 = tpu.matmul %8, %9, %cst_7 {dimension_numbers = #tpu.dot_dimension_numbers<[1], [0], [0], [1], [0, 0, 1, 1], [], []>} : vector<2x32xbf16>, vector<32x128xbf16>, vector<2x128xf32> -> vector<2x128xf32>
    %c0_8 = arith.constant 0 : index
    %c0_9 = arith.constant 0 : index
    %11 = vector.load %arg4[%c0_8, %c0_9] : memref<1x128xbf16, #tpu.memory_space<vmem>>, vector<1x128xbf16>
    %12 = arith.extf %11 : vector<1x128xbf16> to vector<1x128xf32>
    %13 = vector.broadcast %12 : vector<1x128xf32> to vector<2x128xf32>
    %14 = arith.addf %10, %13 : vector<2x128xf32>
    %c0_10 = arith.constant 0 : index
    %c0_11 = arith.constant 0 : index
    %15 = vector.load %arg5[%c0_10, %c0_11] : memref<2x128xf32, #tpu.memory_space<vmem>>, vector<2x128xf32>
    tpu.vector_store %arg5[%c0_10, %c0_11], %14 {strides = array<i32>} : memref<2x128xf32, #tpu.memory_space<vmem>>, vector<2x128xf32>,
    return
  }
}

</mosaic_0001>

<bundles_post_ra>
// kernel: bert_classifier_forward.13
= control target key start
LH: loop header
LB: loop body
LE: loop exit
PB: predicated region body
PF: predicated region fallthrough
CT: control target
= control target key end

     0   :  { %vm19_vm0 = vcmask 785408   ;;  %v149_v0 = vmov 0.0   ;;  %vm150_vm1 = vmmov 0   ;;  %vm47_vm2 = vcmask 261120   ;;  %s193_s1 = inlined_call_operand.vmem [shape: bf16[32,96], index: 1, kind: input, shape index: {}]   ;;  %s194_s0 = inlined_call_operand.vmem [shape: bf16[16,32], index: 0, kind: input, shape index: {}]   ;;  %s195_s2 = inlined_call_operand.vmem [shape: bf16[1,96], index: 2, kind: input, shape index: {}]   ;;  %s196_s3 = inlined_call_operand.vmem [shape: bf16[16,96], index: 3, kind: output, shape index: {}]  }
   0x1   :  { %136 = vmatprep.subr.bf16.mxu0 %v149_v0  ;;  %v146_v1 = vld [vmem:[%s193_s1] sm:$0xff]   ;;  %140 = vmatprep.mubr.msk.bf16.mxu0 %vm150_vm1, %v149_v0  ;;  %20 = vst.msk [vmem:[#allocation2] sm:$0xff] %vm19_vm0, %v149_v0  ;;  %21 = vst.msk [vmem:[#allocation2 + $0x8] sm:$0xff] %vm19_vm0, %v149_v0  ;;  %v147_v2 = vld [vmem:[%s193_s1 + $0x8] sm:$0xff]   ;;  %v104_v4 = vlaneseq  ;;  %vm118_vm3 = vcmask 781312  }
   0x2   :  { %137 = vmatpush3.bf16.msra.mxu0 %v146_v1  ;;  %v148_v3 = vld [vmem:[%s194_s0] sm:$0xff]  }
   0x3   :  { %138 = vmatprep.subr.bf16.mxu0 %v149_v0  ;;  %v105_v6 = vshrl.u32 %v104_v4, 7  ;;  %v102_v8 = vld [vmem:[%s195_s2] sm:$0x1] }
   0x4   :  { %v103_v13 = vunpack.c.l.bf16 %v102_v8 }
   0x5   :  { %v106_v14 = vsub.s32 0, %v105_v6 }
   0x6   :  { %139 = vmatpush3.bf16.msra.mxu0 %v147_v2 }
   0x7   :  { %v107_v17 = vrot.slane %v103_v13, %v106_v14 }
   0x8   :  { %v22_v5 = vld [vmem:[#allocation2] sm:$0xff]  ;;  %v23_v9 = vld [vmem:[#allocation2 + $0x8] sm:$0xff] }
   0x9   :  { %141 = vmatmul.mubr.msk.bf16.vlgmr.msra.gmra.mrb[0].mxu0 %vm47_vm2, %v148_v3 }
  0xdc   :  { %v85_v7 = vpop.f32.mrb[0].mxu0 }
  0xdd   :  { %v92_v10 = vadd.f32 %v85_v7, %v22_v5  ;;  %v142_v11 = vpop.f32.mrb[1].mxu0 }
  0xde   :  { %v88_v12 = vpop.f32.mrb[2].mxu0 }
  0xdf   :  { %95 = vst.msk [vmem:[#allocation2] sm:$0xff] %vm19_vm0, %v92_v10  ;;  %v93_v15 = vadd.f32 %v88_v12, %v23_v9  ;;  %v143_v16 = vpop.f32.mrb[3].mxu0 }
  0xe1   :  { %96 = vst.msk [vmem:[#allocation2 + $0x8] sm:$0xff] %vm19_vm0, %v93_v15 }
  0xe6   :  { %v100_v18 = vld [vmem:[#allocation2] sm:$0xff] }
  0xe7   :  { %v108_v19 = vadd.f32 %v107_v17, %v100_v18 }
  0xe8   :  { %v101_v20 = vld [vmem:[#allocation2 + $0x8] sm:$0xff] }
  0xe9   :  { %v131_v21 = vpack.c.bf16 %v108_v19, %v108_v19  ;;  %v109_v22 = vadd.f32 %v107_v17, %v101_v20 }
  0xeb   :  { %119 = vst.msk [vmem:[%s196_s3] sm:$0xf] %vm118_vm3, %v131_v21  ;;  %v132_v23 = vpack.c.bf16 %v109_v22, %v109_v22 }
  0xed   :  { %120 = vst.msk [vmem:[%s196_s3 + $0x4] sm:$0xf] %vm118_vm3, %v132_v23 }

// kernel: bert_classifier_forward.12
= control target key start
LH: loop header
LB: loop body
LE: loop exit
PB: predicated region body
PF: predicated region fallthrough
CT: control target
= control target key end

     0   :  { %s492_s18 = smov 0   ;;  %s494_s19 = smov 0   ;;  %s544_s0 = inlined_call_operand.vmem [shape: bf16[2,8,32], index: 0, kind: input, shape index: {}]   ;;  %s545_s1 = inlined_call_operand.vmem [shape: bf16[8,32], index: 1, kind: input, shape index: {}]   ;;  %s546_s2 = inlined_call_operand.vmem [shape: bf16[1,32], index: 2, kind: input, shape index: {}]   ;;  %s547_s3 = inlined_call_operand.vmem [shape: bf16[1,32], index: 3, kind: input, shape index: {}]   ;;  %s548_s4 = inlined_call_operand.vmem [shape: bf16[1,32], index: 4, kind: input, shape index: {}]   ;;  %s549_s5 = inlined_call_operand.vmem [shape: bf16[2,8,32], index: 5, kind: output, shape index: {}]  }
   0x1   :  { %s496_s20 = smov 0  }
   0x2 LB: > { %s27_s21 = sadd.s32 1, %s456_s19  ;;  %p407_p0 = scmp.ge.s32.totalorder %s460_s20, 1  ;;  %s460_s20 = sphi %s496_s20, %s15_s20   ;;  %s456_s19 = sphi %s494_s19, %s551_s19   ;;  %s452_s18 = sphi %s492_s18, %s550_s18  }
   0x3   : > { %p29_p1 = scmp.ge.s32.totalorder %s27_s21, 2  ;;  %p214_p2 = scmp.lt.s32.totalorder %s460_s20, 3 }
   0x5   : > { %s553_s21 = smov (%p29_p1, %s27_s21), 0  ;;  %p215_p3 = pnand %p407_p0, %p214_p2 }
   0x6   : > { %p250_p4 = scmp.lt.s32.totalorder (!%p215_p3), %s452_s18, 1  ;;  %v273_v0 = vld [vmem:[%s546_s2] sm:$0x1] (!%p215_p3)  ;;  %v275_v1 = vlaneseq (!%p215_p3)  ;;  %vm280_vm0 = vcmask (!%p215_p3), 261120   ;;  %vm310_vm1 = vcmask (!%p215_p3), 257024  }
   0x7   : > { %218 = sbr.rel (%p215_p3) target bundleno = 340 (0x154), region = 40  ;;  %v270_v2 = vld [vmem:[%s545_s1] sm:$0xf] (!%p215_p3)  ;;  %v274_v4 = vunpack.c.l.bf16 (!%p215_p3), %v273_v0 }
   0x8   : > { %v276_v3 = vshrl.u32 (!%p215_p3), %v275_v1, 7  ;;  %v271_v6 = vunpack.c.l.bf16 (!%p215_p3), %v270_v2  ;;  %v295_v21 = vld [vmem:[%s547_s3] sm:$0x1] (!%p215_p3) }
   0x9   : > { %v302_v22 = vld [vmem:[%s548_s4] sm:$0x1] (!%p215_p3)  ;;  %v296_v23 = vunpack.c.l.bf16 (!%p215_p3), %v295_v21 }
   0xa   : > { %v277_v5 = vsub.s32 (!%p215_p3), 0, %v276_v3  ;;  %v303_v24 = vunpack.c.l.bf16 (!%p215_p3), %v302_v22 }
   0xc   : > { %v278_v9 = vrot.slane (!%p215_p3), %v274_v4, %v277_v5  ;;  %v300_v25 = vrot.slane (!%p215_p3), %v296_v23, %v277_v5  ;;  %v307_v27 = vrot.slane (!%p215_p3), %v303_v24, %v277_v5 }
   0xe   : > { %s555_s18 = smov (!%p250_p4, %s452_s18), 1 }
   0xf   : > { %s408_s26 = sshll.u32 %s555_s18, 2 }
  0x10   : > { %s256_s29 = scalar_lea.vmem %s544_s0, %s408_s26  ;;  %s267_s11 = scalar_lea.vmem %s549_s5, %s408_s26 }
  0x11   : > { %v268_v7 = vld [vmem:[%s256_s29] sm:$0xf] }
  0x12   : > { %v269_v8 = vunpack.c.l.bf16 %v268_v7 }
  0x14   : > { %v272_v10 = vadd.f32 %v271_v6, %v269_v8 }
  0x16   : > { %v279_v11 = vadd.f32 %v278_v9, %v272_v10 }
  0x18   : > { %v281_v12 = vsel %vm280_vm0, %v279_v11, 0.0 }
  0x19   : > { %282 = vadd.xlane.f32.xlu0 %v281_v12 }
  0xa6   : > { %v283_v13 = vpop.xlane.xlu0 %282 }
  0xa7   : > { %v285_v14 = vmul.f32 0.03125, %v283_v13 }
  0xa9   : > { %v286_v15 = vsub.f32 %v279_v11, %v285_v14 }
  0xab   : > { %v287_v16 = vmul.f32 %v286_v15, %v286_v15 }
  0xad   : > { %v288_v17 = vsel %vm280_vm0, %v287_v16, 0.0 }
  0xae   : > { %289 = vadd.xlane.f32.xlu0 %v288_v17 }
 0x13b   : > { %v290_v18 = vpop.xlane.xlu0 %289 }
 0x13c   : > { %v291_v19 = vmul.f32 0.03125, %v290_v18 }
 0x13e   : > { %v292_v20 = vadd.f32 1e-12, %v291_v19 }
 0x140   : > { %436 = vrsqrt.f32 %v292_v20 }
 0x14a   : > { %v437_v26 = vpop.eup %436 }
 0x14b   : > { %v294_v28 = vmul.f32 %v437_v26, %v286_v15 }
 0x14d   : > { %v301_v29 = vmul.f32 %v300_v25, %v294_v28 }
 0x14f   : > { %v308_v30 = vadd.f32 %v307_v27, %v301_v29 }
 0x151   : > { %v309_v31 = vpack.c.bf16 %v308_v30, %v308_v30 }
 0x153   : > { %311 = vst.msk [vmem:[%s267_s11] sm:$0xf] %vm310_vm1, %v309_v31 }
 0x154 PF: > { %s15_s20 = sadd.s32 1, %s460_s20   ;;  %s550_s18 = smov %s456_s19 }
 0x155   : > { %p12_p5 = scmp.ge.s32.totalorder %s15_s20, 4   ;;  %s551_s19 = smov %s553_s21 }
 0x157   :  { %14 = sbr.rel (!%p12_p5) target bundleno = 2 (0x2), region = 73 }

// kernel: bert_classifier_forward.15
= control target key start
LH: loop header
LB: loop body
LE: loop exit
PB: predicated region body
PF: predicated region fallthrough
CT: control target
= control target key end

     0   :  { %vm28_vm0 = vcmask 261120   ;;  %v214_v0 = vmov 0.0   ;;  %vm215_vm1 = vmmov 0   ;;  %v112_v4 = vlaneseq  ;;  %s287_s1 = inlined_call_operand.vmem [shape: bf16[32,32], index: 1, kind: input, shape index: {}]   ;;  %s288_s0 = inlined_call_operand.vmem [shape: bf16[16,32], index: 0, kind: input, shape index: {}]   ;;  %s289_s2 = inlined_call_operand.vmem [shape: bf16[1,32], index: 2, kind: input, shape index: {}]   ;;  %s290_s3 = inlined_call_operand.vmem [shape: bf16[16,32], index: 3, kind: input, shape index: {}]   ;;  %s291_s4 = inlined_call_operand.vmem [shape: bf16[1,32], index: 4, kind: input, shape index: {}]   ;;  %s292_s5 = inlined_call_operand.vmem [shape: bf16[1,32], index: 5, kind: input, shape index: {}]   ;;  %s293_s6 = inlined_call_operand.vmem [shape: bf16[16,32], index: 6, kind: output, shape index: {}]  }
   0x1   :  { %197 = vmatprep.subr.bf16.mxu0 %v214_v0  ;;  %v207_v1 = vld [vmem:[%s287_s1] sm:$0xff]   ;;  %201 = vmatprep.mubr.msk.bf16.mxu0 %vm215_vm1, %v214_v0  ;;  %29 = vst.msk [vmem:[#allocation2] sm:$0xff] %vm28_vm0, %v214_v0  ;;  %30 = vst.msk [vmem:[#allocation2 + $0x8] sm:$0xff] %vm28_vm0, %v214_v0  ;;  %v208_v2 = vld [vmem:[%s287_s1 + $0x8] sm:$0xff]   ;;  %vm175_vm2 = vcmask 257024  }
   0x2   :  { %198 = vmatpush3.bf16.msra.mxu0 %v207_v1  ;;  %v209_v3 = vld [vmem:[%s288_s0] sm:$0xff]   ;;  %v113_v6 = vshrl.u32 %v112_v4, 7 }
   0x3   :  { %199 = vmatprep.subr.bf16.mxu0 %v214_v0  ;;  %v110_v9 = vld [vmem:[%s289_s2] sm:$0x1] }
   0x4   :  { %v111_v15 = vunpack.c.l.bf16 %v110_v9  ;;  %v114_v16 = vsub.s32 0, %v113_v6  ;;  %v191_v17 = vld [vmem:[%s290_s3] sm:$0xff]  }
   0x5   :  { %v192_v19 = vunpack.c.l.bf16 %v191_v17  ;;  %v193_v22 = vunpack.c.h.bf16 %v191_v17  ;;  %v151_v44 = vld [vmem:[%s291_s4] sm:$0x1] }
   0x6   :  { %200 = vmatpush3.bf16.msra.mxu0 %v208_v2  ;;  %v115_v18 = vrot.slane %v111_v15, %v114_v16  ;;  %v159_v46 = vld [vmem:[%s292_s5] sm:$0x1]  ;;  %v152_v47 = vunpack.c.l.bf16 %v151_v44 }
   0x7   :  { %v160_v48 = vunpack.c.l.bf16 %v159_v46 }
   0x8   :  { %v31_v5 = vld [vmem:[#allocation2] sm:$0xff]  ;;  %v32_v8 = vld [vmem:[#allocation2 + $0x8] sm:$0xff]  ;;  %v156_v49 = vrot.slane %v152_v47, %v114_v16 }
   0x9   :  { %202 = vmatmul.mubr.msk.bf16.vlgmr.msra.gmra.mrb[0].mxu0 %vm28_vm0, %v209_v3  ;;  %v164_v51 = vrot.slane %v160_v48, %v114_v16 }
  0xdc   :  { %v94_v7 = vpop.f32.mrb[0].mxu0 }
  0xdd   :  { %v101_v10 = vadd.f32 %v94_v7, %v31_v5  ;;  %v203_v11 = vpop.f32.mrb[1].mxu0 }
  0xde   :  { %v97_v12 = vpop.f32.mrb[2].mxu0 }
  0xdf   :  { %103 = vst.msk [vmem:[#allocation2] sm:$0xff] %vm28_vm0, %v101_v10  ;;  %v102_v13 = vadd.f32 %v97_v12, %v32_v8  ;;  %v204_v14 = vpop.f32.mrb[3].mxu0 }
  0xe1   :  { %104 = vst.msk [vmem:[#allocation2 + $0x8] sm:$0xff] %vm28_vm0, %v102_v13 }
  0xe6   :  { %v108_v20 = vld [vmem:[#allocation2] sm:$0xff] }
  0xe7   :  { %v116_v21 = vadd.f32 %v115_v18, %v108_v20 }
  0xe8   :  { %v109_v23 = vld [vmem:[#allocation2 + $0x8] sm:$0xff] }
  0xe9   :  { %v122_v24 = vadd.f32 %v192_v19, %v116_v21  ;;  %v117_v25 = vadd.f32 %v115_v18, %v109_v23 }
  0xeb   :  { %v124_v26 = vsel %vm28_vm0, %v122_v24, 0.0  ;;  %v123_v27 = vadd.f32 %v193_v22, %v117_v25 }
  0xec   :  { %125 = vadd.xlane.f32.xlu0 %v124_v26 }
  0xed   :  { %v127_v28 = vsel %vm28_vm0, %v123_v27, 0.0 }
  0xf0   :  { %128 = vadd.xlane.f32.xlu0 %v127_v28 }
 0x179   :  { %v126_v29 = vpop.xlane.xlu0 %125 }
 0x17a   :  { %v131_v30 = vmul.f32 0.03125, %v126_v29 }
 0x17c   :  { %v133_v31 = vsub.f32 %v122_v24, %v131_v30 }
 0x17d   :  { %v129_v32 = vpop.xlane.xlu0 %128 }
 0x17e   :  { %v132_v33 = vmul.f32 0.03125, %v129_v32  ;;  %v135_v34 = vmul.f32 %v133_v31, %v133_v31 }
 0x180   :  { %v134_v35 = vsub.f32 %v123_v27, %v132_v33  ;;  %v137_v36 = vsel %vm28_vm0, %v135_v34, 0.0 }
 0x181   :  { %138 = vadd.xlane.f32.xlu1 %v137_v36 }
 0x182   :  { %v136_v37 = vmul.f32 %v134_v35, %v134_v35 }
 0x184   :  { %v140_v38 = vsel %vm28_vm0, %v136_v37, 0.0 }
 0x185   :  { %141 = vadd.xlane.f32.xlu1 %v140_v38 }
 0x20e   :  { %v139_v39 = vpop.xlane.xlu1 %138 }
 0x20f   :  { %v143_v40 = vmul.f32 0.03125, %v139_v39 }
 0x211   :  { %v145_v41 = vadd.f32 1e-12, %v143_v40 }
 0x212   :  { %v142_v42 = vpop.xlane.xlu1 %141 }
 0x213   :  { %210 = vrsqrt.f32 %v145_v41  ;;  %v144_v43 = vmul.f32 0.03125, %v142_v42 }
 0x215   :  { %v146_v45 = vadd.f32 1e-12, %v144_v43 }
 0x217   :  { %212 = vrsqrt.f32 %v146_v45 }
 0x21d   :  { %v211_v50 = vpop.eup %210 }
 0x21e   :  { %v149_v52 = vmul.f32 %v211_v50, %v133_v31 }
 0x220   :  { %v157_v53 = vmul.f32 %v156_v49, %v149_v52 }
 0x221   :  { %v213_v54 = vpop.eup %212 }
 0x222   :  { %v165_v55 = vadd.f32 %v164_v51, %v157_v53  ;;  %v150_v56 = vmul.f32 %v213_v54, %v134_v35 }
 0x224   :  { %v188_v57 = vpack.c.bf16 %v165_v55, %v165_v55  ;;  %v158_v58 = vmul.f32 %v156_v49, %v150_v56 }
 0x226   :  { %176 = vst.msk [vmem:[%s293_s6] sm:$0xf] %vm175_vm2, %v188_v57  ;;  %v166_v59 = vadd.f32 %v164_v51, %v158_v58 }
 0x228   :  { %v189_v60 = vpack.c.bf16 %v166_v59, %v166_v59 }
 0x22a   :  { %177 = vst.msk [vmem:[%s293_s6 + $0x4] sm:$0xf] %vm175_vm2, %v189_v60 }

// kernel: bert_classifier_forward.14
= control target key start
LH: loop header
LB: loop body
LE: loop exit
PB: predicated region body
PF: predicated region fallthrough
CT: control target
= control target key end

     0   :  { %s565_s9 = smov 0   ;;  %s610_s0 = inlined_call_operand.vmem [shape: bf16[2,8,96], index: 0, kind: input, shape index: {}]   ;;  %s611_s1 = inlined_call_operand.vmem [shape: f32[2,1,8], index: 1, kind: input, shape index: {}]   ;;  %s612_s2 = inlined_call_operand.vmem [shape: bf16[2,8,32], index: 2, kind: output, shape index: {}]  }
   0x1 LB: > { %s461_s10 = sadd.s32 4294967295, %s540_s9   ;;  %p465_p0 = scmp.ge.s32.totalorder %s540_s9, 1  ;;  %s540_s9 = sphi %s565_s9, %s12_s9  }
   0x2   : > { %p119_p1 = scmp.lt.s32.totalorder %s540_s9, 3 }
   0x4   : > { %p120_p2 = pnand %p465_p0, %p119_p1 }
   0x5   : > { %p142_p3 = scmp.lt.s32.totalorder (!%p120_p2), %s461_s10, 1  ;;  %v542_v0 = vmov (!%p120_p2), 0.0   ;;  %vm543_vm0 = vmmov (!%p120_p2), 0   ;;  %s544_s15 = smov (!%p120_p2), 96   ;;  %vm169_vm1 = vcmask (!%p120_p2), 130048   ;;  %vm216_vm2 = vcmask (!%p120_p2), 64512  }
   0x6   : > { %123 = sbr.rel (%p120_p2) target bundleno = 1231 (0x4cf), region = 28  ;;  %485 = vmatprep.subr.bf16.mxu0 (!%p120_p2), %v542_v0  ;;  %487 = vmatprep.mubr.msk.bf16.mxu0 (!%p120_p2), %vm543_vm0, %v542_v0  ;;  %s545_s16 = smov (!%p120_p2), 64   ;;  %vm233_vm3 = vcmask (!%p120_p2), 1043456   ;;  %vm397_vm4 = vcmask (!%p120_p2), 257024  }
   0x7   : > { %491 = vmatprep.subr.bf16.mxu1 (!%p120_p2), %v542_v0  ;;  %493 = vmatprep.mubr.msk.bf16.mxu1 (!%p120_p2), %vm543_vm0, %v542_v0  ;;  %s546_s17 = smov (!%p120_p2), 80   ;;  %s547_s18 = smov (!%p120_p2), 112  }
   0x8   : > { %s548_s22 = smov (!%p120_p2), 48   ;;  %s549_s23 = smov (!%p120_p2), 16  }
   0xd   : > { %s614_s10 = smov (!%p142_p3, %s461_s10), 1 }
   0xe   : > { %s466_s11 = sshll.u32 %s614_s10, 2  ;;  %s148_s21 = scalar_lea.vmem %s611_s1, %s614_s10 }
   0xf   : > { %s145_s14 = scalar_lea.vmem %s610_s0, %s466_s11  ;;  %v468_v7 = vld [vmem:[%s148_s21] ss:$0 sm:$0xff]  ;;  %s152_s26 = scalar_lea.vmem %s612_s2, %s466_s11 }
  0x10   : > { %v156_v1 = vld [vmem:[%s145_s14] sm:$0xf] }
  0x11   : > { %v469_v2 = vcombine.low %v156_v1, %v156_v1  ;;  %v157_v5 = vmul.bf16 1048592000, %v156_v1 }
  0x13   : > { %167 = vrot.lane.b32.xlu0 %v469_v2, %s544_s15  ;;  %228 = vrot.lane.b32.xlu1 %v469_v2, %s545_s16  ;;  %v472_v6 = vcombine.low %v157_v5, %v157_v5 }
  0x17   : > { %283 = vrot.lane.b32.xlu1 %v469_v2, %s546_s17 }
  0x1b   : > { %281 = vrot.lane.b32.xlu1 %v472_v6, %s547_s18 }
  0x85   : > { %v168_v3 = vpop.permute.xlu0 %167  ;;  %v229_v14 = vpop.permute.xlu1 %228 }
  0x86   : > { %v174_v4 = vsel %vm169_vm1, %v168_v3, 0  ;;  %v235_v15 = vsel %vm233_vm3, %v229_v14, 0 }
  0x87   : > { %486 = vmatpush3.bf16.xpose.msra.mxu0 %v174_v4  ;;  %492 = vmatpush3.bf16.msra.mxu1 %v235_v15 }
  0x88   : > { %503 = vmatprep.subr.bf16.mxu0 %v542_v0  ;;  %497 = vmatprep.subr.bf16.mxu1 %v542_v0 }
  0x89   : > { %v284_v19 = vpop.permute.xlu1 %283 }
  0x8a   : > { %v289_v21 = vsel %vm169_vm1, %v284_v19, 0 }
  0x8d   : > { %v282_v23 = vpop.permute.xlu1 %281 }
  0x8e   : > { %488 = vmatmul.mubr.msk.bf16.vlgmr.msra.gmra.mrb[0].mxu0 %vm169_vm1, %v157_v5 }
  0x8f   : > { %505 = vmatprep.mubr.msk.bf16.mxu0 %vm543_vm0, %v542_v0 }
 0x161   : > { %v210_v8 = vpop.f32.mrb[0].mxu0 }
 0x162   : > { %v211_v9 = vadd.f32 %v468_v7, %v210_v8  ;;  %v489_v10 = vpop.f32.mrb[1].mxu0 }
 0x163   : > { %v213_v11 = vpop.f32.mrb[2].mxu0 }
 0x164   : > { %v490_v12 = vpop.f32.mrb[3].mxu0  ;;  %v217_v13 = vsel %vm216_vm2, %v211_v9, -inf }
 0x165   : > { %218 = vmax.xlane.f32.xlu0 %v217_v13 }
 0x17b   : > { %342 = vrot.lane.b32.xlu0 %v469_v2, %s548_s22 }
 0x1f2   : > { %v219_v16 = vpop.xlane.xlu0 %218 }
 0x1f3   : > { %v220_v17 = vsub.f32 %v211_v9, %v219_v16 }
 0x1f5   : > { %v221_v18 = vmul.f32 1.442695, %v220_v17 }
 0x1f6   : > { %v343_v34 = vpop.permute.xlu0 %342 }
 0x1f7   : > { %526 = vpow2.f32 %v221_v18  ;;  %v348_v35 = vsel %vm233_vm3, %v343_v34, 0 }
 0x1f8   : > { %504 = vmatpush3.bf16.msra.mxu0 %v348_v35 }
 0x201   : > { %v527_v20 = vpop.eup %526 }
 0x202   : > { %v227_v22 = vpack.c.bf16 %v527_v20, %v527_v20  ;;  %v223_v42 = vsel %vm216_vm2, %v527_v20, 0.0 }
 0x204   : > { %494 = vmatmul.mubr.msk.bf16.vlgmr.msra.gmra.mrb[0].mxu1 %vm216_vm2, %v227_v22 }
 0x205   : > { %498 = vmatpush3.bf16.xpose.msra.mxu1 %v289_v21  ;;  %499 = vmatprep.mubr.msk.bf16.mxu1 %vm543_vm0, %v542_v0 }
 0x20c   : > { %500 = vmatmul.mubr.msk.bf16.vlgmr.msra.gmra.mrb[4].mxu1 %vm169_vm1, %v282_v23 }
 0x2d7   : > { %v271_v24 = vpop.f32.mrb[0].mxu1 }
 0x2d8   : > { %v495_v25 = vpop.f32.mrb[1].mxu1 }
 0x2d9   : > { %v274_v26 = vpop.f32.mrb[2].mxu1 }
 0x2da   : > { %v496_v27 = vpop.f32.mrb[3].mxu1 }
 0x2df   : > { %v325_v28 = vpop.f32.mrb[4].mxu1 }
 0x2e0   : > { %v326_v29 = vadd.f32 %v468_v7, %v325_v28  ;;  %v501_v30 = vpop.f32.mrb[5].mxu1 }
 0x2e1   : > { %v328_v31 = vpop.f32.mrb[6].mxu1 }
 0x2e2   : > { %v502_v32 = vpop.f32.mrb[7].mxu1  ;;  %v331_v33 = vsel %vm216_vm2, %v326_v29, -inf }
 0x2e3   : > { %332 = vmax.xlane.f32.xlu1 %v331_v33 }
 0x370   : > { %v333_v36 = vpop.xlane.xlu1 %332 }
 0x371   : > { %v334_v37 = vsub.f32 %v326_v29, %v333_v36 }
 0x373   : > { %v335_v38 = vmul.f32 1.442695, %v334_v37 }
 0x375   : > { %528 = vpow2.f32 %v335_v38 }
 0x37f   : > { %v529_v39 = vpop.eup %528 }
 0x380   : > { %v337_v40 = vsel %vm216_vm2, %v529_v39, 0.0  ;;  %v341_v41 = vpack.c.bf16 %v529_v39, %v529_v39 }
 0x381   : > { %338 = vadd.xlane.f32.xlu1 %v337_v40 }
 0x382   : > { %506 = vmatmul.mubr.msk.bf16.vlgmr.msra.gmra.mrb[4].mxu0 %vm216_vm2, %v341_v41 }
 0x385   : > { %224 = vadd.xlane.f32.xlu1 %v223_v42 }
 0x40e   : > { %v339_v43 = vpop.xlane.xlu1 %338 }
 0x40f   : > { %530 = vrcp.f32 %v339_v43 }
 0x412   : > { %v225_v50 = vpop.xlane.xlu1 %224 }
 0x413   : > { %532 = vrcp.f32 %v225_v50 }
 0x419   : > { %v531_v44 = vpop.eup %530 }
 0x41d   : > { %v533_v51 = vpop.eup %532 }
 0x41e   : > { %v277_v52 = vmul.f32 %v533_v51, %v271_v24 }
 0x455   : > { %v384_v45 = vpop.f32.mrb[4].mxu0 }
 0x456   : > { %v390_v46 = vmul.f32 %v531_v44, %v384_v45  ;;  %v507_v47 = vpop.f32.mrb[5].mxu0 }
 0x457   : > { %v387_v48 = vpop.f32.mrb[6].mxu0 }
 0x458   : > { %392 = vrot.lane.b32.xlu1 %v390_v46, %s549_s23  ;;  %v508_v49 = vpop.f32.mrb[7].mxu0 }
 0x4ca   : > { %v393_v53 = vpop.permute.xlu1 %392 }
 0x4cb   : > { %v395_v54 = vsel %vm169_vm1, %v277_v52, %v393_v53 }
 0x4cc   : > { %v396_v55 = vpack.c.bf16 %v395_v54, %v395_v54 }
 0x4ce   : > { %398 = vst.msk [vmem:[%s152_s26] sm:$0xf] %vm397_vm4, %v396_v55 }
 0x4cf PF: > { %s12_s9 = sadd.s32 1, %s540_s9  }
 0x4d0   : > { %p9_p4 = scmp.ge.s32.totalorder %s12_s9, 4  }
 0x4d2   :  { %11 = sbr.rel (!%p9_p4) target bundleno = 1 (0x1), region = 61 }

// kernel: bert_classifier_forward.16
= control target key start
LH: loop header
LB: loop body
LE: loop exit
PB: predicated region body
PF: predicated region fallthrough
CT: control target
= control target key end

     0   :  { %vm19_vm0 = vcmask 523264   ;;  %v171_v0 = vmov 0.0   ;;  %vm172_vm1 = vmmov 0   ;;  %vm47_vm2 = vcmask 261120   ;;  %s215_s1 = inlined_call_operand.vmem [shape: bf16[32,64], index: 1, kind: input, shape index: {}]   ;;  %s216_s0 = inlined_call_operand.vmem [shape: bf16[16,32], index: 0, kind: input, shape index: {}]   ;;  %s217_s2 = inlined_call_operand.vmem [shape: bf16[1,64], index: 2, kind: input, shape index: {}]   ;;  %s218_s3 = inlined_call_operand.vmem [shape: bf16[16,64], index: 3, kind: output, shape index: {}]  }
   0x1   :  { %154 = vmatprep.subr.bf16.mxu0 %v171_v0  ;;  %v164_v1 = vld [vmem:[%s215_s1] sm:$0xff]   ;;  %158 = vmatprep.mubr.msk.bf16.mxu0 %vm172_vm1, %v171_v0  ;;  %20 = vst.msk [vmem:[#allocation2] sm:$0xff] %vm19_vm0, %v171_v0  ;;  %21 = vst.msk [vmem:[#allocation2 + $0x8] sm:$0xff] %vm19_vm0, %v171_v0  ;;  %v165_v2 = vld [vmem:[%s215_s1 + $0x8] sm:$0xff]   ;;  %v104_v4 = vlaneseq  ;;  %vm136_vm3 = vcmask 519168  }
   0x2   :  { %155 = vmatpush3.bf16.msra.mxu0 %v164_v1  ;;  %v166_v3 = vld [vmem:[%s216_s0] sm:$0xff]  }
   0x3   :  { %156 = vmatprep.subr.bf16.mxu0 %v171_v0  ;;  %v105_v6 = vshrl.u32 %v104_v4, 7  ;;  %v102_v8 = vld [vmem:[%s217_s2] sm:$0x1] }
   0x4   :  { %v103_v13 = vunpack.c.l.bf16 %v102_v8 }
   0x5   :  { %v106_v14 = vsub.s32 0, %v105_v6 }
   0x6   :  { %157 = vmatpush3.bf16.msra.mxu0 %v165_v2 }
   0x7   :  { %v107_v17 = vrot.slane %v103_v13, %v106_v14 }
   0x8   :  { %v22_v5 = vld [vmem:[#allocation2] sm:$0xff]  ;;  %v23_v9 = vld [vmem:[#allocation2 + $0x8] sm:$0xff] }
   0x9   :  { %159 = vmatmul.mubr.msk.bf16.vlgmr.msra.gmra.mrb[0].mxu0 %vm47_vm2, %v166_v3 }
  0xdc   :  { %v85_v7 = vpop.f32.mrb[0].mxu0 }
  0xdd   :  { %v92_v10 = vadd.f32 %v85_v7, %v22_v5  ;;  %v160_v11 = vpop.f32.mrb[1].mxu0 }
  0xde   :  { %v88_v12 = vpop.f32.mrb[2].mxu0 }
  0xdf   :  { %95 = vst.msk [vmem:[#allocation2] sm:$0xff] %vm19_vm0, %v92_v10  ;;  %v93_v15 = vadd.f32 %v88_v12, %v23_v9  ;;  %v161_v16 = vpop.f32.mrb[3].mxu0 }
  0xe1   :  { %96 = vst.msk [vmem:[#allocation2 + $0x8] sm:$0xff] %vm19_vm0, %v93_v15 }
  0xe6   :  { %v100_v18 = vld [vmem:[#allocation2] sm:$0xff] }
  0xe7   :  { %v108_v19 = vadd.f32 %v107_v17, %v100_v18 }
  0xe8   :  { %v101_v20 = vld [vmem:[#allocation2 + $0x8] sm:$0xff] }
  0xe9   :  { %v110_v21 = vmul.f32 %v108_v19, %v108_v19  ;;  %v109_v22 = vadd.f32 %v107_v17, %v101_v20 }
  0xeb   :  { %v112_v23 = vmul.f32 %v110_v21, %v108_v19  ;;  %v111_v24 = vmul.f32 %v109_v22, %v109_v22 }
  0xed   :  { %v114_v25 = vmul.f32 0.044715, %v112_v23  ;;  %v113_v26 = vmul.f32 %v111_v24, %v109_v22 }
  0xef   :  { %v116_v27 = vadd.f32 %v114_v25, %v108_v19  ;;  %v115_v28 = vmul.f32 0.044715, %v113_v26 }
  0xf1   :  { %v118_v29 = vmul.f32 0.7978846, %v116_v27  ;;  %v117_v30 = vadd.f32 %v115_v28, %v109_v22 }
  0xf3   :  { %167 = vtanh.f32 %v118_v29  ;;  %v119_v31 = vmul.f32 0.7978846, %v117_v30 }
  0xf5   :  { %169 = vtanh.f32 %v119_v31 }
  0xfd   :  { %v168_v32 = vpop.eup %167 }
  0xfe   :  { %v122_v33 = vadd.f32 1.0, %v168_v32 }
  0xff   :  { %v170_v34 = vpop.eup %169 }
 0x100   :  { %v124_v35 = vmul.f32 0.5, %v122_v33  ;;  %v123_v36 = vadd.f32 1.0, %v170_v34 }
 0x102   :  { %v126_v37 = vmul.f32 %v124_v35, %v108_v19  ;;  %v125_v38 = vmul.f32 0.5, %v123_v36 }
 0x104   :  { %v149_v39 = vpack.c.bf16 %v126_v37, %v126_v37  ;;  %v127_v40 = vmul.f32 %v125_v38, %v109_v22 }
 0x106   :  { %137 = vst.msk [vmem:[%s218_s3] sm:$0xf] %vm136_vm3, %v149_v39  ;;  %v150_v41 = vpack.c.bf16 %v127_v40, %v127_v40 }
 0x108   :  { %138 = vst.msk [vmem:[%s218_s3 + $0x4] sm:$0xf] %vm136_vm3, %v150_v41 }

// kernel: bert_classifier_forward.23
= control target key start
LH: loop header
LB: loop body
LE: loop exit
PB: predicated region body
PF: predicated region fallthrough
CT: control target
= control target key end

     0   :  { %v232_v1 = vmov 0.0   ;;  %vm233_vm0 = vmmov 0   ;;  %s300_s0 = inlined_call_operand.vmem [shape: bf16[2,32], index: 0, kind: input, shape index: {}]   ;;  %s301_s1 = inlined_call_operand.vmem [shape: bf16[32,32], index: 1, kind: input, shape index: {}]   ;;  %s302_s2 = inlined_call_operand.vmem [shape: bf16[1,32], index: 2, kind: input, shape index: {}]   ;;  %s303_s3 = inlined_call_operand.vmem [shape: bf16[32,128], index: 3, kind: input, shape index: {}]   ;;  %s304_s4 = inlined_call_operand.vmem [shape: bf16[1,128], index: 4, kind: input, shape index: {}]   ;;  %s305_s5 = inlined_call_operand.hbm [shape: f32[2,128], index: 5, kind: output, shape index: {}]  }
   0x1   :  { %v202_v0 = vld [vmem:[%s301_s1] sm:$0xff]   ;;  %183 = vmatprep.subr.bf16.mxu0 %v232_v1  ;;  %191 = vmatprep.subr.bf16.mxu1 %v232_v1  ;;  %v203_v2 = vld [vmem:[%s301_s1 + $0x8] sm:$0xff]  }
   0x2   :  { %184 = vmatpush3.bf16.msra.mxu0 %v202_v0  ;;  %187 = vmatprep.mubr.msk.bf16.mxu0 %vm233_vm0, %v232_v1 }
   0x3   :  { %185 = vmatprep.subr.bf16.mxu0 %v232_v1  ;;  %195 = vmatprep.mubr.msk.bf16.mxu1 %vm233_vm0, %v232_v1 }
   0x4   :  { %10 = vsyncpa [#allocation3], 0  ;;  %v22_v3 = vld [vmem:[%s300_s0] sm:$0x1]  ;;  %vm45_vm1 = vcmask 261120   ;;  %v205_v5 = vld [vmem:[%s303_s3 + $0x8] sm:$0xff]   ;;  %v29_v6 = vlaneseq }
   0x5   :  { %v204_v4 = vld [vmem:[%s303_s3] sm:$0xff]  }
   0x6   :  { %186 = vmatpush3.bf16.msra.mxu0 %v203_v2  ;;  %192 = vmatpush3.bf16.msra.mxu1 %v204_v4  ;;  %v30_v7 = vshrl.u32 %v29_v6, 7  ;;  %v27_v8 = vld [vmem:[%s302_s2] sm:$0x1]  ;;  %s234_s2 = smov [#allocation2]  }
   0x7   :  { %193 = vmatprep.subr.bf16.mxu1 %v232_v1  ;;  %v28_v9 = vunpack.c.l.bf16 %v27_v8  ;;  %v95_v19 = vld [vmem:[%s304_s4] sm:$0x1]  ;;  %s163_s29 = sshll.u32 %s234_s2, 4  ;;  %s164_s29 = int_to_ptr.vmem [resolvable:$true] %s163_s29 }
   0x8   :  { %v31_v10 = vsub.s32 0, %v30_v7  ;;  %v96_v20 = vunpack.c.l.bf16 %v95_v19  ;;  %s208_s30 = scalar_lea.vmem %s164_s29, 32  ;;  %p213_p1 = scmp.lt.s32.totalorder %s164_s29, %s164_s29 }
   0x9   :  { %188 = vmatmul.mubr.msk.bf16.vlgmr.msra.gmra.mrb[0].mxu0 %vm45_vm1, %v22_v3  ;;  %p209_p0 = scmp.ne.s32.totalorder %s164_s29, %s208_s30  ;;  %p214_p2 = scmp.lt.s32.totalorder %s208_s30, %s208_s30 }
   0xa   :  { %194 = vmatpush3.bf16.msra.mxu1 %v205_v5  ;;  %v32_v11 = vrot.slane %v28_v9, %v31_v10  ;;  %v100_v21 = vrot.slane %v96_v20, %v31_v10 }
   0xb   :  { %p215_p3 = por %p214_p2, %p213_p1 }
   0xd   :  { %p216_p4 = pnand %p215_p3, %p209_p0 }
  0xdc   :  { %v83_v12 = vpop.f32.mrb[0].mxu0 }
  0xdd   :  { %v84_v13 = vadd.f32 %v83_v12, %v32_v11  ;;  %v189_v14 = vpop.f32.mrb[1].mxu0 }
  0xde   :  { %v86_v15 = vpop.f32.mrb[2].mxu0 }
  0xdf   :  { %206 = vtanh.f32 %v84_v13  ;;  %v190_v16 = vpop.f32.mrb[3].mxu0 }
  0xe9   :  { %v207_v17 = vpop.eup %206 }
  0xea   :  { %v90_v18 = vpack.c.bf16 %v207_v17, %v207_v17 }
  0xec   :  { %196 = vmatmul.mubr.msk.bf16.vlgmr.msra.gmra.mrb[0].mxu1 %vm45_vm1, %v90_v18 }
 0x1bf   :  { %v150_v22 = vpop.f32.mrb[0].mxu1 }
 0x1c0   :  { %v151_v23 = vadd.f32 %v150_v22, %v100_v21  ;;  %v197_v24 = vpop.f32.mrb[1].mxu1 }
 0x1c1   :  { %v153_v25 = vpop.f32.mrb[2].mxu1 }
 0x1c2   :  { %156 = vst [vmem:[#allocation2] sm:$0x3] %v151_v23  ;;  %v198_v26 = vpop.f32.mrb[3].mxu1 }
 0x1c3   :  { %219 = shalt.err (!%p216_p4)
}
 0x1c4   :  { %s220_s7 = scalar_lea.hbm %s305_s5, 32 }
 0x1c5   :  { %p221_p5 = scmp.ne.s32.totalorder %s305_s5, %s220_s7  ;;  %p224_p6 = scmp.lt.u32.totalorder %s220_s7, %s305_s5 }
 0x1c7   :  { %p226_p7 = pnand %p224_p6, %p221_p5 }
 0x1c9   :  { %229 = shalt.err (!%p226_p7)
}
 0x1ca   :  { %166 = dma.vmem_to_hbm [thread:$0]  %s164_s29, 32, %s305_s5, [#allocation3]  }
 0x1cb   :  { %230 = dma.done.wait [#allocation3], 32  }
 0x1cc   :  { %231 = vsyncadd [#allocation3], 4294967264 }
 0x1cd   :  { %170 = vsyncpa [#allocation3], 1 }

// kernel: bert_classifier_forward.17
= control target key start
LH: loop header
LB: loop body
LE: loop exit
PB: predicated region body
PF: predicated region fallthrough
CT: control target
= control target key end

     0   :  { %vm28_vm0 = vcmask 261120   ;;  %v241_v0 = vmov 0.0   ;;  %vm242_vm1 = vmmov 0   ;;  %vm72_vm2 = vcmask 523264   ;;  %s319_s1 = inlined_call_operand.vmem [shape: bf16[64,32], index: 1, kind: input, shape index: {}]   ;;  %s320_s0 = inlined_call_operand.vmem [shape: bf16[16,64], index: 0, kind: input, shape index: {}]   ;;  %s321_s2 = inlined_call_operand.vmem [shape: bf16[1,32], index: 2, kind: input, shape index: {}]   ;;  %s322_s3 = inlined_call_operand.vmem [shape: bf16[16,32], index: 3, kind: input, shape index: {}]   ;;  %s323_s4 = inlined_call_operand.vmem [shape: bf16[1,32], index: 4, kind: input, shape index: {}]   ;;  %s324_s5 = inlined_call_operand.vmem [shape: bf16[1,32], index: 5, kind: input, shape index: {}]   ;;  %s325_s6 = inlined_call_operand.vmem [shape: bf16[16,32], index: 6, kind: output, shape index: {}]  }
   0x1   :  { %218 = vmatprep.subr.bf16.mxu0 %v241_v0  ;;  %v232_v1 = vld [vmem:[%s319_s1] sm:$0xff]   ;;  %226 = vmatprep.mubr.msk.bf16.mxu0 %vm242_vm1, %v241_v0  ;;  %29 = vst.msk [vmem:[#allocation2] sm:$0xff] %vm28_vm0, %v241_v0  ;;  %30 = vst.msk [vmem:[#allocation2 + $0x8] sm:$0xff] %vm28_vm0, %v241_v0  ;;  %v233_v2 = vld [vmem:[%s319_s1 + $0x8] sm:$0xff]   ;;  %v129_v6 = vlaneseq  ;;  %vm192_vm3 = vcmask 257024  }
   0x2   :  { %219 = vmatpush3.bf16.msra.mxu0 %v232_v1  ;;  %v234_v3 = vld [vmem:[%s319_s1 + $0x10] sm:$0xff]   ;;  %v235_v4 = vld [vmem:[%s319_s1 + $0x18] sm:$0xff]   ;;  %v236_v5 = vld [vmem:[%s320_s0] sm:$0xff]  }
   0x3   :  { %220 = vmatprep.subr.bf16.mxu0 %v241_v0  ;;  %v130_v8 = vshrl.u32 %v129_v6, 7  ;;  %v127_v11 = vld [vmem:[%s321_s2] sm:$0x1] }
   0x4   :  { %v128_v17 = vunpack.c.l.bf16 %v127_v11  ;;  %v210_v19 = vld [vmem:[%s322_s3] sm:$0xff]  }
   0x5   :  { %v131_v18 = vsub.s32 0, %v130_v8  ;;  %v211_v21 = vunpack.c.l.bf16 %v210_v19  ;;  %v212_v24 = vunpack.c.h.bf16 %v210_v19  ;;  %v168_v46 = vld [vmem:[%s323_s4] sm:$0x1] }
   0x6   :  { %221 = vmatpush3.bf16.msra.mxu0 %v233_v2  ;;  %v176_v48 = vld [vmem:[%s324_s5] sm:$0x1]  ;;  %v169_v49 = vunpack.c.l.bf16 %v168_v46 }
   0x7   :  { %222 = vmatprep.subr.bf16.mxu0 %v241_v0  ;;  %v132_v20 = vrot.slane %v128_v17, %v131_v18  ;;  %v177_v50 = vunpack.c.l.bf16 %v176_v48 }
   0x8   :  { %v31_v7 = vld [vmem:[#allocation2] sm:$0xff]  ;;  %v32_v10 = vld [vmem:[#allocation2 + $0x8] sm:$0xff]  ;;  %v173_v51 = vrot.slane %v169_v49, %v131_v18 }
   0x9   :  { %v181_v53 = vrot.slane %v177_v50, %v131_v18 }
   0xa   :  { %223 = vmatpush3.bf16.msra.mxu0 %v234_v3 }
   0xb   :  { %224 = vmatprep.subr.bf16.mxu0 %v241_v0 }
   0xe   :  { %225 = vmatpush3.bf16.msra.mxu0 %v235_v4 }
  0x11   :  { %227 = vmatmul.mubr.msk.bf16.vlgmr.msra.gmra.mrb[0].mxu0 %vm72_vm2, %v236_v5 }
  0xe4   :  { %v110_v9 = vpop.f32.mrb[0].mxu0 }
  0xe5   :  { %v117_v12 = vadd.f32 %v110_v9, %v31_v7  ;;  %v228_v13 = vpop.f32.mrb[1].mxu0 }
  0xe6   :  { %v113_v14 = vpop.f32.mrb[2].mxu0 }
  0xe7   :  { %120 = vst.msk [vmem:[#allocation2] sm:$0xff] %vm28_vm0, %v117_v12  ;;  %v118_v15 = vadd.f32 %v113_v14, %v32_v10  ;;  %v229_v16 = vpop.f32.mrb[3].mxu0 }
  0xe9   :  { %121 = vst.msk [vmem:[#allocation2 + $0x8] sm:$0xff] %vm28_vm0, %v118_v15 }
  0xee   :  { %v125_v22 = vld [vmem:[#allocation2] sm:$0xff] }
  0xef   :  { %v133_v23 = vadd.f32 %v132_v20, %v125_v22 }
  0xf0   :  { %v126_v25 = vld [vmem:[#allocation2 + $0x8] sm:$0xff] }
  0xf1   :  { %v139_v26 = vadd.f32 %v211_v21, %v133_v23  ;;  %v134_v27 = vadd.f32 %v132_v20, %v126_v25 }
  0xf3   :  { %v141_v28 = vsel %vm28_vm0, %v139_v26, 0.0  ;;  %v140_v29 = vadd.f32 %v212_v24, %v134_v27 }
  0xf4   :  { %142 = vadd.xlane.f32.xlu0 %v141_v28 }
  0xf5   :  { %v144_v30 = vsel %vm28_vm0, %v140_v29, 0.0 }
  0xf8   :  { %145 = vadd.xlane.f32.xlu0 %v144_v30 }
 0x181   :  { %v143_v31 = vpop.xlane.xlu0 %142 }
 0x182   :  { %v148_v32 = vmul.f32 0.03125, %v143_v31 }
 0x184   :  { %v150_v33 = vsub.f32 %v139_v26, %v148_v32 }
 0x185   :  { %v146_v34 = vpop.xlane.xlu0 %145 }
 0x186   :  { %v149_v35 = vmul.f32 0.03125, %v146_v34  ;;  %v152_v36 = vmul.f32 %v150_v33, %v150_v33 }
 0x188   :  { %v151_v37 = vsub.f32 %v140_v29, %v149_v35  ;;  %v154_v38 = vsel %vm28_vm0, %v152_v36, 0.0 }
 0x189   :  { %155 = vadd.xlane.f32.xlu1 %v154_v38 }
 0x18a   :  { %v153_v39 = vmul.f32 %v151_v37, %v151_v37 }
 0x18c   :  { %v157_v40 = vsel %vm28_vm0, %v153_v39, 0.0 }
 0x18d   :  { %158 = vadd.xlane.f32.xlu1 %v157_v40 }
 0x216   :  { %v156_v41 = vpop.xlane.xlu1 %155 }
 0x217   :  { %v160_v42 = vmul.f32 0.03125, %v156_v41 }
 0x219   :  { %v162_v43 = vadd.f32 1e-12, %v160_v42 }
 0x21a   :  { %v159_v44 = vpop.xlane.xlu1 %158 }
 0x21b   :  { %237 = vrsqrt.f32 %v162_v43  ;;  %v161_v45 = vmul.f32 0.03125, %v159_v44 }
 0x21d   :  { %v163_v47 = vadd.f32 1e-12, %v161_v45 }
 0x21f   :  { %239 = vrsqrt.f32 %v163_v47 }
 0x225   :  { %v238_v52 = vpop.eup %237 }
 0x226   :  { %v166_v54 = vmul.f32 %v238_v52, %v150_v33 }
 0x228   :  { %v174_v55 = vmul.f32 %v173_v51, %v166_v54 }
 0x229   :  { %v240_v56 = vpop.eup %239 }
 0x22a   :  { %v182_v57 = vadd.f32 %v181_v53, %v174_v55  ;;  %v167_v58 = vmul.f32 %v240_v56, %v151_v37 }
 0x22c   :  { %v207_v59 = vpack.c.bf16 %v182_v57, %v182_v57  ;;  %v175_v60 = vmul.f32 %v173_v51, %v167_v58 }
 0x22e   :  { %193 = vst.msk [vmem:[%s325_s6] sm:$0xf] %vm192_vm3, %v207_v59  ;;  %v183_v61 = vadd.f32 %v181_v53, %v175_v60 }
 0x230   :  { %v208_v62 = vpack.c.bf16 %v183_v61, %v183_v61 }
 0x232   :  { %194 = vst.msk [vmem:[%s325_s6 + $0x4] sm:$0xf] %vm192_vm3, %v208_v62 }

</bundles_post_ra>
